<compile_context>
chip_gen: v7x
topology: tpu7x:2x2x1
jax: 0.10.0
libtpu: 0.0.40
codegen_flags: <defaults>
</compile_context>

<pallas_src>
import functools
import math

import jax
import jax.numpy as jnp
from jax.experimental import pallas as pl
from jax.experimental.pallas import tpu as pltpu


def bilstm_kernel(x_ref, wih_ref, whh_ref, b_ref, o_ref, xp_sc, *, T, B, Hp):
    """Fused bidirectional LSTM over a full sequence resident in VMEM.

    x_ref   : (T*B, E)        time-major flattened embeddings (row = t*B + b)
    wih_ref : (E, 8*Hp)       fused input weights, gate-type-major column layout
                              [i_f,i_b | f_f,f_b | o_f,o_b | g_f,g_b] (Hp-wide blocks)
    whh_ref : (2*Hp, 8*Hp)    block-diagonal fused recurrent weights, rows = [h_f | h_b]
    b_ref   : (1, 8*Hp)       fused bias (b_ih + b_hh per direction), same column layout
    o_ref   : (T*B, 2*Hp)     outputs, row = t*B + b, cols [fwd Hp | bwd Hp]
    xp_sc   : (T*B, 8*Hp)     VMEM scratch: hoisted input projection (+ bias)
    """
    H2, H6, H8 = 2 * Hp, 6 * Hp, 8 * Hp

    # Hoisted input projection: one big MXU matmul for all timesteps & both directions,
    # bias folded in here (off the recurrence critical path). f32 accumulation.
    xp_sc[...] = (
        jnp.dot(x_ref[...], wih_ref[...], preferred_element_type=jnp.float32)
        + b_ref[...]
    )

    # Hoisted column mask: even Hp-wide blocks hold forward-direction gate columns.
    col = jax.lax.broadcasted_iota(jnp.int32, (B, H8), 1)
    fwd_cols = (col % H2) < Hp

    mm_dtype = whh_ref.dtype  # bf16 on the MXU if requested; state/gates stay f32

    def step(s, carry):
        h, c = carry                       # (B, 2*Hp) f32 each, layout [fwd | bwd]
        t_b = T - 1 - s                    # timestep processed by the backward direction
        row_f = pl.multiple_of(s * B, 8)
        row_b = pl.multiple_of(t_b * B, 8)

        # Single fused recurrent matmul (block-diagonal W_hh) -> (B, 8*Hp) f32.
        rec = jnp.dot(h.astype(mm_dtype), whh_ref[...],
                      preferred_element_type=jnp.float32)

        # Forward gate columns come from time s, backward columns from time T-1-s:
        # one full-width select instead of 8 fragmented Hp-wide slices.
        xp_f = xp_sc[pl.ds(row_f, B), :]
        xp_b = xp_sc[pl.ds(row_b, B), :]
        pre = rec + jnp.where(fwd_cols, xp_f, xp_b)

        # One wide sigmoid push (i, f, o for both directions) + one tanh push (g).
        sig = jax.nn.sigmoid(pre[:, :H6])
        g = jnp.tanh(pre[:, H6:])          # (B, 2*Hp)
        i_g = sig[:, :H2]
        f_g = sig[:, H2:2 * H2]
        o_g = sig[:, 2 * H2:]

        c_new = f_g * c + i_g * g          # fused fwd+bwd state update, lane-dense
        h_new = o_g * jnp.tanh(c_new)

        # Forward hidden of time s, backward hidden of time (T-1-s).
        o_ref[pl.ds(row_f, B), pl.ds(0, Hp)] = h_new[:, :Hp]
        o_ref[pl.ds(row_b, B), pl.ds(Hp, Hp)] = h_new[:, Hp:]
        return h_new, c_new

    h0 = jnp.zeros((B, H2), jnp.float32)
    c0 = jnp.zeros((B, H2), jnp.float32)
    jax.lax.fori_loop(0, T, step, (h0, c0), unroll=True)


def _padded_vmem_bytes(shape, dtype):
    """Rough VMEM footprint of a 2-D array incl. sublane/lane padding."""
    itemsize = jnp.dtype(dtype).itemsize
    sub = {4: 8, 2: 16, 1: 32}.get(itemsize, 8)
    rows = -(-shape[-2] // sub) * sub
    cols = -(-shape[-1] // 128) * 128
    lead = math.prod(shape[:-2]) if len(shape) > 2 else 1
    return lead * rows * cols * itemsize


def _fuse_weights(params, H, Hp, matmul_dtype):
    """Build fused, gate-reordered, zero-padded weights.

    Column layout (8*Hp wide), gate-type-major, Hp-wide blocks:
        [ i_f | i_b | f_f | f_b | o_f | o_b | g_f | g_b ]
    Fused W_hh row layout (2*Hp): [ h_f | h_b ].  PyTorch gate order in the raw weights
    is [i, f, g, o]; it is reordered to [i, f, o, g] so sigmoid/tanh slices are contiguous.
    Padded rows/columns are zero, which keeps padded hidden units exactly zero.
    """
    f32 = jnp.float32
    E = params["w_ih_f"].shape[1]

    def ifog(w):  # last dim = 4H in PyTorch order [i,f,g,o] -> blocks in order [i,f,o,g]
        i, f, g, o = jnp.split(w, 4, axis=-1)
        return (i, f, o, g)

    wih = jnp.zeros((E, 8 * Hp), f32)
    whh = jnp.zeros((2 * Hp, 8 * Hp), f32)
    bias = jnp.zeros((1, 8 * Hp), f32)
    for d, sfx in enumerate(("f", "b")):
        wih_blk = ifog(params[f"w_ih_{sfx}"].T.astype(f32))                    # (E, H) x4
        whh_blk = ifog(params[f"w_hh_{sfx}"].T.astype(f32))                    # (H, H) x4
        b_blk = ifog((params[f"b_ih_{sfx}"] + params[f"b_hh_{sfx}"]).astype(f32)[None, :])
        r0 = d * Hp
        for gi in range(4):
            c0 = (2 * gi + d) * Hp
            wih = wih.at[:, c0:c0 + H].set(wih_blk[gi])
            whh = whh.at[r0:r0 + H, c0:c0 + H].set(whh_blk[gi])
            bias = bias.at[:, c0:c0 + H].set(b_blk[gi])
    return wih.astype(matmul_dtype), whh.astype(matmul_dtype), bias


def bilstm_encoder_forward(tokens, params, *, matmul_dtype=jnp.float32):
    """Forward pass equivalent to BiLSTMEncoder.forward(text) -> (B, T, 2H).

    matmul_dtype=jnp.bfloat16 puts only the MXU operands in bf16 (f32 accumulation and
    f32 gate math / state) — recommended on v6e/v7x; use a ~1e-2 tolerance.
    """
    B, T = tokens.shape
    H = params["w_hh_f"].shape[1]
    E = params["embedding"].shape[1]

    # Pad hidden to a multiple of 64 so the fused output width 2*Hp is lane-dense (128).
    Hp = -(-H // 64) * 64
    # Batch padded to a sublane multiple (8 for f32 state; 16 if MXU operands are bf16).
    sub = 16 if jnp.dtype(matmul_dtype).itemsize == 2 else 8
    B_pad = -(-B // sub) * sub

    # Embedding lookup directly in time-major order (data-dependent gather stays in JAX).
    emb = params["embedding"][tokens.T].astype(jnp.float32)        # (T, B, E)
    emb = jnp.pad(emb, ((0, 0), (0, B_pad - B), (0, 0)))
    x_flat = emb.reshape(T * B_pad, E).astype(matmul_dtype)

    wih, whh, bias = _fuse_weights(params, H, Hp, matmul_dtype)

    # Resident VMEM budget (no grid -> no double-buffering of any operand).
    budget = sum(_padded_vmem_bytes(s, d) for s, d in (
        ((T * B_pad, E), matmul_dtype),          # x
        ((E, 8 * Hp), matmul_dtype),             # wih
        ((2 * Hp, 8 * Hp), matmul_dtype),        # whh
        ((1, 8 * Hp), jnp.float32),              # bias
        ((T * B_pad, 2 * Hp), jnp.float32),      # out
        ((T * B_pad, 8 * Hp), jnp.float32),      # xp scratch (dominant term)
    ))
    # TODO(synk): over-budget shapes (notably v7x's 64 MiB VMEM) need the T-chunked grid path.
    assert budget <= 44 * 1024 * 1024, f"resident VMEM budget too large: {budget} bytes"

    out_flat = pl.pallas_call(
        functools.partial(bilstm_kernel, T=T, B=B_pad, Hp=Hp),
        out_shape=jax.ShapeDtypeStruct((T * B_pad, 2 * Hp), jnp.float32),
        in_specs=[pl.BlockSpec(memory_space=pltpu.MemorySpace.VMEM)] * 4,
        out_specs=pl.BlockSpec(memory_space=pltpu.MemorySpace.VMEM),
        scratch_shapes=[pltpu.VMEM((T * B_pad, 8 * Hp), jnp.float32)],
        compiler_params=pltpu.CompilerParams(vmem_limit_bytes=48 * 1024 * 1024),
    )(x_flat, wih, whh, bias)

    out = out_flat.reshape(T, B_pad, 2 * Hp)[:, :B, :]             # (T, B, 2*Hp)
    out = jnp.concatenate([out[..., :H], out[..., Hp:Hp + H]], axis=-1)   # (T, B, 2H)
    return jnp.transpose(out, (1, 0, 2))                           # (B, T, 2H)


# ---------------- pure-JAX reference (for correctness check) ----------------
def _ref_lstm_dir(x_tbe, w_ih, w_hh, b_ih, b_hh):
    H = w_hh.shape[1]
    B = x_tbe.shape[1]

    def step(carry, x_t):
        h, c = carry
        gates = x_t @ w_ih.T + b_ih + h @ w_hh.T + b_hh
        i = jax.nn.sigmoid(gates[:, :H])
        f = jax.nn.sigmoid(gates[:, H:2 * H])
        g = jnp.tanh(gates[:, 2 * H:3 * H])
        o = jax.nn.sigmoid(gates[:, 3 * H:])
        c = f * c + i * g
        h = o * jnp.tanh(c)
        return (h, c), h

    init = (jnp.zeros((B, H), jnp.float32), jnp.zeros((B, H), jnp.float32))
    _, hs = jax.lax.scan(step, init, x_tbe)
    return hs


def _ref_forward(tokens, params):
    emb = params["embedding"][tokens]
    x_tbe = jnp.transpose(emb, (1, 0, 2))
    out_f = _ref_lstm_dir(x_tbe, params["w_ih_f"], params["w_hh_f"],
                          params["b_ih_f"], params["b_hh_f"])
    out_b = _ref_lstm_dir(x_tbe[::-1], params["w_ih_b"], params["w_hh_b"],
                          params["b_ih_b"], params["b_hh_b"])[::-1]
    return jnp.transpose(jnp.concatenate([out_f, out_b], axis=-1), (1, 0, 2))


def init_params(key, vocab_size, embedding_dim, lstm_dim):
    """Deterministic synthetic init mirroring nn.Embedding + nn.LSTM parameter shapes."""
    ks = jax.random.split(key, 9)
    H, E = lstm_dim, embedding_dim
    k = 1.0 / jnp.sqrt(jnp.float32(H))  # PyTorch LSTM uniform(-1/sqrt(H), 1/sqrt(H))
    u = lambda kk, shape: jax.random.uniform(kk, shape, jnp.float32, -k, k)
    return {
        "embedding": jax.random.normal(ks[0], (vocab_size, E), jnp.float32),
        "w_ih_f": u(ks[1], (4 * H, E)),
        "w_hh_f": u(ks[2], (4 * H, H)),
        "b_ih_f": u(ks[3], (4 * H,)),
        "b_hh_f": u(ks[4], (4 * H,)),
        "w_ih_b": u(ks[5], (4 * H, E)),
        "w_hh_b": u(ks[6], (4 * H, H)),
        "b_ih_b": u(ks[7], (4 * H,)),
        "b_hh_b": u(ks[8], (4 * H,)),
    }


if __name__ == "__main__":
    B, T = 2, 8
    vocab_size, embedding_dim, lstm_dim = 100, 32, 32

    key = jax.random.PRNGKey(0)
    k_tok, k_par = jax.random.split(key)
    tokens = jax.random.randint(k_tok, (B, T), 0, vocab_size, dtype=jnp.int32)
    params = init_params(k_par, vocab_size, embedding_dim, lstm_dim)

    ref = jax.block_until_ready(_ref_forward(tokens, params))

    # f32 MXU operands: exact-ish match with the reference.
    out = jax.block_until_ready(bilstm_encoder_forward(tokens, params))
    assert out.shape == (B, T, 2 * lstm_dim), out.shape
    assert jnp.allclose(out, ref, atol=1e-5, rtol=1e-5), float(jnp.max(jnp.abs(out - ref)))

    # bf16 MXU operands (v6e/v7x fast path), f32 accumulation & gate math: loose tolerance.
    out_bf16 = jax.block_until_ready(
        bilstm_encoder_forward(tokens, params, matmul_dtype=jnp.bfloat16))
    assert jnp.allclose(out_bf16, ref, atol=5e-2, rtol=5e-2), \
        float(jnp.max(jnp.abs(out_bf16 - ref)))

    print("KERNEL_OK")
</pallas_src>

<mosaic_0001>
module attributes {stable_mosaic.version = 11 : i64} {
  func.func @bilstm_kernel(%arg0: memref<64x32xf32, #tpu.memory_space<vmem>>, %arg1: memref<32x512xf32, #tpu.memory_space<vmem>>, %arg2: memref<128x512xf32, #tpu.memory_space<vmem>>, %arg3: memref<1x512xf32, #tpu.memory_space<vmem>>, %arg4: memref<64x128xf32, #tpu.memory_space<vmem>>, %arg5: memref<64x512xf32, #tpu.memory_space<vmem>>) attributes {dimension_semantics = [], scalar_prefetch = 0 : i64, scratch_operands = 1 : i64, tpu.core_type = #tpu.core_type<tc>} {
    %c0 = arith.constant 0 : index
    %c0_0 = arith.constant 0 : index
    %0 = vector.load %arg0[%c0, %c0_0] : memref<64x32xf32, #tpu.memory_space<vmem>>, vector<64x32xf32>
    %c0_1 = arith.constant 0 : index
    %c0_2 = arith.constant 0 : index
    %1 = vector.load %arg1[%c0_1, %c0_2] : memref<32x512xf32, #tpu.memory_space<vmem>>, vector<32x512xf32>
    %cst = arith.constant dense<0.000000e+00> : vector<64x512xf32>
    %2 = tpu.matmul %0, %1, %cst {dimension_numbers = #tpu.dot_dimension_numbers<[1], [0], [0], [1], [0, 0, 1, 1], [], []>} : vector<64x32xf32>, vector<32x512xf32>, vector<64x512xf32> -> vector<64x512xf32>
    %c0_3 = arith.constant 0 : index
    %c0_4 = arith.constant 0 : index
    %3 = vector.load %arg3[%c0_3, %c0_4] : memref<1x512xf32, #tpu.memory_space<vmem>>, vector<1x512xf32>
    %4 = vector.broadcast %3 : vector<1x512xf32> to vector<64x512xf32>
    %5 = arith.addf %2, %4 : vector<64x512xf32>
    %c0_5 = arith.constant 0 : index
    %c0_6 = arith.constant 0 : index
    %6 = vector.load %arg5[%c0_5, %c0_6] : memref<64x512xf32, #tpu.memory_space<vmem>>, vector<64x512xf32>
    tpu.vector_store %arg5[%c0_5, %c0_6], %5 {strides = array<i32>} : memref<64x512xf32, #tpu.memory_space<vmem>>, vector<64x512xf32>,
    %7 = tpu.iota {dimensions = array<i32: 1>} : vector<8x512xi32>
    %c128_i32 = arith.constant 128 : i32
    %c0_i32 = arith.constant 0 : i32
    %8 = arith.cmpi eq, %c128_i32, %c0_i32 : i32
    %c1_i32 = arith.constant 1 : i32
    %9 = arith.select %8, %c1_i32, %c128_i32 : i32
    %10 = vector.broadcast %9 : i32 to vector<8x512xi32>
    %11 = arith.remsi %7, %10 : vector<8x512xi32>
    %c0_i32_7 = arith.constant 0 : i32
    %12 = vector.broadcast %c0_i32_7 : i32 to vector<8x512xi32>
    %13 = arith.cmpi ne, %11, %12 : vector<8x512xi32>
    %c0_i32_8 = arith.constant 0 : i32
    %14 = vector.broadcast %c0_i32_8 : i32 to vector<8x512xi32>
    %15 = arith.cmpi slt, %11, %14 : vector<8x512xi32>
    %c0_i32_9 = arith.constant 0 : i32
    %16 = arith.cmpi slt, %9, %c0_i32_9 : i32
    %17 = vector.broadcast %16 : i1 to vector<8x512xi1>
    %18 = vector.broadcast %17 : vector<8x512xi1> to vector<8x512xi1>
    %19 = arith.xori %15, %18 : vector<8x512xi1>
    %20 = arith.andi %19, %13 : vector<8x512xi1>
    %21 = vector.broadcast %9 : i32 to vector<8x512xi32>
    %22 = arith.addi %11, %21 : vector<8x512xi32>
    %23 = arith.select %20, %22, %11 : vector<8x512xi1>, vector<8x512xi32>
    %c64_i32 = arith.constant 64 : i32
    %24 = vector.broadcast %c64_i32 : i32 to vector<8x512xi32>
    %25 = arith.cmpi slt, %23, %24 : vector<8x512xi32>
    %cst_10 = arith.constant 0.000000e+00 : f32
    %26 = vector.broadcast %cst_10 : f32 to vector<8x128xf32>
    %cst_11 = arith.constant 0.000000e+00 : f32
    %27 = vector.broadcast %cst_11 : f32 to vector<8x128xf32>
    %c0_i32_12 = arith.constant 0 : i32
    %c7_i32 = arith.constant 7 : i32
    %28 = arith.subi %c7_i32, %c0_i32_12 : i32
    %c8_i32 = arith.constant 8 : i32
    %29 = arith.muli %c0_i32_12, %c8_i32 : i32
    %30 = tpu.assume_multiple %29, 8 : i32
    %c8_i32_13 = arith.constant 8 : i32
    %31 = arith.muli %28, %c8_i32_13 : i32
    %32 = tpu.assume_multiple %31, 8 : i32
    %c0_14 = arith.constant 0 : index
    %c0_15 = arith.constant 0 : index
    %33 = vector.load %arg2[%c0_14, %c0_15] : memref<128x512xf32, #tpu.memory_space<vmem>>, vector<128x512xf32>
    %cst_16 = arith.constant dense<0.000000e+00> : vector<8x512xf32>
    %34 = tpu.matmul %26, %33, %cst_16 {dimension_numbers = #tpu.dot_dimension_numbers<[1], [0], [0], [1], [0, 0, 1, 1], [], []>} : vector<8x128xf32>, vector<128x512xf32>, vector<8x512xf32> -> vector<8x512xf32>
    %35 = arith.index_cast %30 : i32 to index
    %c0_17 = arith.constant 0 : index
    %36 = vector.load %arg5[%35, %c0_17] : memref<64x512xf32, #tpu.memory_space<vmem>>, vector<8x512xf32>
    %37 = arith.index_cast %32 : i32 to index
    %c0_18 = arith.constant 0 : index
    %38 = vector.load %arg5[%37, %c0_18] : memref<64x512xf32, #tpu.memory_space<vmem>>, vector<8x512xf32>
    %39 = arith.select %25, %36, %38 : vector<8x512xi1>, vector<8x512xf32>
    %40 = arith.addf %34, %39 : vector<8x512xf32>
    %41 = vector.extract_strided_slice %40 {offsets = [0, 0], sizes = [8, 384], strides = [1, 1]} : vector<8x512xf32> to vector<8x384xf32>
    %42 = arith.negf %41 : vector<8x384xf32>
    %43 = math.exp %42 : vector<8x384xf32>
    %cst_19 = arith.constant 1.000000e+00 : f32
    %44 = vector.broadcast %cst_19 : f32 to vector<8x384xf32>
    %45 = arith.addf %44, %43 : vector<8x384xf32>
    %46 = arith.divf %44, %45 : vector<8x384xf32>
    %47 = vector.extract_strided_slice %40 {offsets = [0, 384], sizes = [8, 128], strides = [1, 1]} : vector<8x512xf32> to vector<8x128xf32>
    %48 = math.tanh %47 : vector<8x128xf32>
    %49 = vector.extract_strided_slice %46 {offsets = [0, 0], sizes = [8, 128], strides = [1, 1]} : vector<8x384xf32> to vector<8x128xf32>
    %50 = vector.extract_strided_slice %46 {offsets = [0, 128], sizes = [8, 128], strides = [1, 1]} : vector<8x384xf32> to vector<8x128xf32>
    %51 = vector.extract_strided_slice %46 {offsets = [0, 256], sizes = [8, 128], strides = [1, 1]} : vector<8x384xf32> to vector<8x128xf32>
    %52 = arith.mulf %50, %27 : vector<8x128xf32>
    %53 = arith.mulf %49, %48 : vector<8x128xf32>
    %54 = arith.addf %52, %53 : vector<8x128xf32>
    %55 = math.tanh %54 : vector<8x128xf32>
    %56 = arith.mulf %51, %55 : vector<8x128xf32>
    %57 = vector.extract_strided_slice %56 {offsets = [0, 0], sizes = [8, 64], strides = [1, 1]} : vector<8x128xf32> to vector<8x64xf32>
    %58 = arith.index_cast %30 : i32 to index
    %c0_20 = arith.constant 0 : index
    %59 = vector.load %arg4[%58, %c0_20] : memref<64x128xf32, #tpu.memory_space<vmem>>, vector<8x64xf32>
    tpu.vector_store %arg4[%58, %c0_20], %57 {strides = array<i32>} : memref<64x128xf32, #tpu.memory_space<vmem>>, vector<8x64xf32>,
    %60 = vector.extract_strided_slice %56 {offsets = [0, 64], sizes = [8, 64], strides = [1, 1]} : vector<8x128xf32> to vector<8x64xf32>
    %61 = arith.index_cast %32 : i32 to index
    %c64 = arith.constant 64 : index
    %62 = vector.load %arg4[%61, %c64] : memref<64x128xf32, #tpu.memory_space<vmem>>, vector<8x64xf32>
    tpu.vector_store %arg4[%61, %c64], %60 {strides = array<i32>} : memref<64x128xf32, #tpu.memory_space<vmem>>, vector<8x64xf32>,
    %c1_i32_21 = arith.constant 1 : i32
    %c7_i32_22 = arith.constant 7 : i32
    %63 = arith.subi %c7_i32_22, %c1_i32_21 : i32
    %c8_i32_23 = arith.constant 8 : i32
    %64 = arith.muli %c1_i32_21, %c8_i32_23 : i32
    %65 = tpu.assume_multiple %64, 8 : i32
    %c8_i32_24 = arith.constant 8 : i32
    %66 = arith.muli %63, %c8_i32_24 : i32
    %67 = tpu.assume_multiple %66, 8 : i32
    %c0_25 = arith.constant 0 : index
    %c0_26 = arith.constant 0 : index
    %68 = vector.load %arg2[%c0_25, %c0_26] : memref<128x512xf32, #tpu.memory_space<vmem>>, vector<128x512xf32>
    %cst_27 = arith.constant dense<0.000000e+00> : vector<8x512xf32>
    %69 = tpu.matmul %56, %68, %cst_27 {dimension_numbers = #tpu.dot_dimension_numbers<[1], [0], [0], [1], [0, 0, 1, 1], [], []>} : vector<8x128xf32>, vector<128x512xf32>, vector<8x512xf32> -> vector<8x512xf32>
    %70 = arith.index_cast %65 : i32 to index
    %c0_28 = arith.constant 0 : index
    %71 = vector.load %arg5[%70, %c0_28] : memref<64x512xf32, #tpu.memory_space<vmem>>, vector<8x512xf32>
    %72 = arith.index_cast %67 : i32 to index
    %c0_29 = arith.constant 0 : index
    %73 = vector.load %arg5[%72, %c0_29] : memref<64x512xf32, #tpu.memory_space<vmem>>, vector<8x512xf32>
    %74 = arith.select %25, %71, %73 : vector<8x512xi1>, vector<8x512xf32>
    %75 = arith.addf %69, %74 : vector<8x512xf32>
    %76 = vector.extract_strided_slice %75 {offsets = [0, 0], sizes = [8, 384], strides = [1, 1]} : vector<8x512xf32> to vector<8x384xf32>
    %77 = arith.negf %76 : vector<8x384xf32>
    %78 = math.exp %77 : vector<8x384xf32>
    %cst_30 = arith.constant 1.000000e+00 : f32
    %79 = vector.broadcast %cst_30 : f32 to vector<8x384xf32>
    %80 = arith.addf %79, %78 : vector<8x384xf32>
    %81 = arith.divf %79, %80 : vector<8x384xf32>
    %82 = vector.extract_strided_slice %75 {offsets = [0, 384], sizes = [8, 128], strides = [1, 1]} : vector<8x512xf32> to vector<8x128xf32>
    %83 = math.tanh %82 : vector<8x128xf32>
    %84 = vector.extract_strided_slice %81 {offsets = [0, 0], sizes = [8, 128], strides = [1, 1]} : vector<8x384xf32> to vector<8x128xf32>
    %85 = vector.extract_strided_slice %81 {offsets = [0, 128], sizes = [8, 128], strides = [1, 1]} : vector<8x384xf32> to vector<8x128xf32>
    %86 = vector.extract_strided_slice %81 {offsets = [0, 256], sizes = [8, 128], strides = [1, 1]} : vector<8x384xf32> to vector<8x128xf32>
    %87 = arith.mulf %85, %54 : vector<8x128xf32>
    %88 = arith.mulf %84, %83 : vector<8x128xf32>
    %89 = arith.addf %87, %88 : vector<8x128xf32>
    %90 = math.tanh %89 : vector<8x128xf32>
    %91 = arith.mulf %86, %90 : vector<8x128xf32>
    %92 = vector.extract_strided_slice %91 {offsets = [0, 0], sizes = [8, 64], strides = [1, 1]} : vector<8x128xf32> to vector<8x64xf32>
    %93 = arith.index_cast %65 : i32 to index
    %c0_31 = arith.constant 0 : index
    %94 = vector.load %arg4[%93, %c0_31] : memref<64x128xf32, #tpu.memory_space<vmem>>, vector<8x64xf32>
    tpu.vector_store %arg4[%93, %c0_31], %92 {strides = array<i32>} : memref<64x128xf32, #tpu.memory_space<vmem>>, vector<8x64xf32>,
    %95 = vector.extract_strided_slice %91 {offsets = [0, 64], sizes = [8, 64], strides = [1, 1]} : vector<8x128xf32> to vector<8x64xf32>
    %96 = arith.index_cast %67 : i32 to index
    %c64_32 = arith.constant 64 : index
    %97 = vector.load %arg4[%96, %c64_32] : memref<64x128xf32, #tpu.memory_space<vmem>>, vector<8x64xf32>
    tpu.vector_store %arg4[%96, %c64_32], %95 {strides = array<i32>} : memref<64x128xf32, #tpu.memory_space<vmem>>, vector<8x64xf32>,
    %c2_i32 = arith.constant 2 : i32
    %c7_i32_33 = arith.constant 7 : i32
    %98 = arith.subi %c7_i32_33, %c2_i32 : i32
    %c8_i32_34 = arith.constant 8 : i32
    %99 = arith.muli %c2_i32, %c8_i32_34 : i32
    %100 = tpu.assume_multiple %99, 8 : i32
    %c8_i32_35 = arith.constant 8 : i32
    %101 = arith.muli %98, %c8_i32_35 : i32
    %102 = tpu.assume_multiple %101, 8 : i32
    %c0_36 = arith.constant 0 : index
    %c0_37 = arith.constant 0 : index
    %103 = vector.load %arg2[%c0_36, %c0_37] : memref<128x512xf32, #tpu.memory_space<vmem>>, vector<128x512xf32>
    %cst_38 = arith.constant dense<0.000000e+00> : vector<8x512xf32>
    %104 = tpu.matmul %91, %103, %cst_38 {dimension_numbers = #tpu.dot_dimension_numbers<[1], [0], [0], [1], [0, 0, 1, 1], [], []>} : vector<8x128xf32>, vector<128x512xf32>, vector<8x512xf32> -> vector<8x512xf32>
    %105 = arith.index_cast %100 : i32 to index
    %c0_39 = arith.constant 0 : index
    %106 = vector.load %arg5[%105, %c0_39] : memref<64x512xf32, #tpu.memory_space<vmem>>, vector<8x512xf32>
    %107 = arith.index_cast %102 : i32 to index
    %c0_40 = arith.constant 0 : index
    %108 = vector.load %arg5[%107, %c0_40] : memref<64x512xf32, #tpu.memory_space<vmem>>, vector<8x512xf32>
    %109 = arith.select %25, %106, %108 : vector<8x512xi1>, vector<8x512xf32>
    %110 = arith.addf %104, %109 : vector<8x512xf32>
    %111 = vector.extract_strided_slice %110 {offsets = [0, 0], sizes = [8, 384], strides = [1, 1]} : vector<8x512xf32> to vector<8x384xf32>
    %112 = arith.negf %111 : vector<8x384xf32>
    %113 = math.exp %112 : vector<8x384xf32>
    %cst_41 = arith.constant 1.000000e+00 : f32
    %114 = vector.broadcast %cst_41 : f32 to vector<8x384xf32>
    %115 = arith.addf %114, %113 : vector<8x384xf32>
    %116 = arith.divf %114, %115 : vector<8x384xf32>
    %117 = vector.extract_strided_slice %110 {offsets = [0, 384], sizes = [8, 128], strides = [1, 1]} : vector<8x512xf32> to vector<8x128xf32>
    %118 = math.tanh %117 : vector<8x128xf32>
    %119 = vector.extract_strided_slice %116 {offsets = [0, 0], sizes = [8, 128], strides = [1, 1]} : vector<8x384xf32> to vector<8x128xf32>
    %120 = vector.extract_strided_slice %116 {offsets = [0, 128], sizes = [8, 128], strides = [1, 1]} : vector<8x384xf32> to vector<8x128xf32>
    %121 = vector.extract_strided_slice %116 {offsets = [0, 256], sizes = [8, 128], strides = [1, 1]} : vector<8x384xf32> to vector<8x128xf32>
    %122 = arith.mulf %120, %89 : vector<8x128xf32>
    %123 = arith.mulf %119, %118 : vector<8x128xf32>
    %124 = arith.addf %122, %123 : vector<8x128xf32>
    %125 = math.tanh %124 : vector<8x128xf32>
    %126 = arith.mulf %121, %125 : vector<8x128xf32>
    %127 = vector.extract_strided_slice %126 {offsets = [0, 0], sizes = [8, 64], strides = [1, 1]} : vector<8x128xf32> to vector<8x64xf32>
    %128 = arith.index_cast %100 : i32 to index
    %c0_42 = arith.constant 0 : index
    %129 = vector.load %arg4[%128, %c0_42] : memref<64x128xf32, #tpu.memory_space<vmem>>, vector<8x64xf32>
    tpu.vector_store %arg4[%128, %c0_42], %127 {strides = array<i32>} : memref<64x128xf32, #tpu.memory_space<vmem>>, vector<8x64xf32>,
    %130 = vector.extract_strided_slice %126 {offsets = [0, 64], sizes = [8, 64], strides = [1, 1]} : vector<8x128xf32> to vector<8x64xf32>
    %131 = arith.index_cast %102 : i32 to index
    %c64_43 = arith.constant 64 : index
    %132 = vector.load %arg4[%131, %c64_43] : memref<64x128xf32, #tpu.memory_space<vmem>>, vector<8x64xf32>
    tpu.vector_store %arg4[%131, %c64_43], %130 {strides = array<i32>} : memref<64x128xf32, #tpu.memory_space<vmem>>, vector<8x64xf32>,
    %c3_i32 = arith.constant 3 : i32
    %c7_i32_44 = arith.constant 7 : i32
    %133 = arith.subi %c7_i32_44, %c3_i32 : i32
    %c8_i32_45 = arith.constant 8 : i32
    %134 = arith.muli %c3_i32, %c8_i32_45 : i32
    %135 = tpu.assume_multiple %134, 8 : i32
    %c8_i32_46 = arith.constant 8 : i32
    %136 = arith.muli %133, %c8_i32_46 : i32
    %137 = tpu.assume_multiple %136, 8 : i32
    %c0_47 = arith.constant 0 : index
    %c0_48 = arith.constant 0 : index
    %138 = vector.load %arg2[%c0_47, %c0_48] : memref<128x512xf32, #tpu.memory_space<vmem>>, vector<128x512xf32>
    %cst_49 = arith.constant dense<0.000000e+00> : vector<8x512xf32>
    %139 = tpu.matmul %126, %138, %cst_49 {dimension_numbers = #tpu.dot_dimension_numbers<[1], [0], [0], [1], [0, 0, 1, 1], [], []>} : vector<8x128xf32>, vector<128x512xf32>, vector<8x512xf32> -> vector<8x512xf32>
    %140 = arith.index_cast %135 : i32 to index
    %c0_50 = arith.constant 0 : index
    %141 = vector.load %arg5[%140, %c0_50] : memref<64x512xf32, #tpu.memory_space<vmem>>, vector<8x512xf32>
    %142 = arith.index_cast %137 : i32 to index
    %c0_51 = arith.constant 0 : index
    %143 = vector.load %arg5[%142, %c0_51] : memref<64x512xf32, #tpu.memory_space<vmem>>, vector<8x512xf32>
    %144 = arith.select %25, %141, %143 : vector<8x512xi1>, vector<8x512xf32>
    %145 = arith.addf %139, %144 : vector<8x512xf32>
    %146 = vector.extract_strided_slice %145 {offsets = [0, 0], sizes = [8, 384], strides = [1, 1]} : vector<8x512xf32> to vector<8x384xf32>
    %147 = arith.negf %146 : vector<8x384xf32>
    %148 = math.exp %147 : vector<8x384xf32>
    %cst_52 = arith.constant 1.000000e+00 : f32
    %149 = vector.broadcast %cst_52 : f32 to vector<8x384xf32>
    %150 = arith.addf %149, %148 : vector<8x384xf32>
    %151 = arith.divf %149, %150 : vector<8x384xf32>
    %152 = vector.extract_strided_slice %145 {offsets = [0, 384], sizes = [8, 128], strides = [1, 1]} : vector<8x512xf32> to vector<8x128xf32>
    %153 = math.tanh %152 : vector<8x128xf32>
    %154 = vector.extract_strided_slice %151 {offsets = [0, 0], sizes = [8, 128], strides = [1, 1]} : vector<8x384xf32> to vector<8x128xf32>
    %155 = vector.extract_strided_slice %151 {offsets = [0, 128], sizes = [8, 128], strides = [1, 1]} : vector<8x384xf32> to vector<8x128xf32>
    %156 = vector.extract_strided_slice %151 {offsets = [0, 256], sizes = [8, 128], strides = [1, 1]} : vector<8x384xf32> to vector<8x128xf32>
    %157 = arith.mulf %155, %124 : vector<8x128xf32>
    %158 = arith.mulf %154, %153 : vector<8x128xf32>
    %159 = arith.addf %157, %158 : vector<8x128xf32>
    %160 = math.tanh %159 : vector<8x128xf32>
    %161 = arith.mulf %156, %160 : vector<8x128xf32>
    %162 = vector.extract_strided_slice %161 {offsets = [0, 0], sizes = [8, 64], strides = [1, 1]} : vector<8x128xf32> to vector<8x64xf32>
    %163 = arith.index_cast %135 : i32 to index
    %c0_53 = arith.constant 0 : index
    %164 = vector.load %arg4[%163, %c0_53] : memref<64x128xf32, #tpu.memory_space<vmem>>, vector<8x64xf32>
    tpu.vector_store %arg4[%163, %c0_53], %162 {strides = array<i32>} : memref<64x128xf32, #tpu.memory_space<vmem>>, vector<8x64xf32>,
    %165 = vector.extract_strided_slice %161 {offsets = [0, 64], sizes = [8, 64], strides = [1, 1]} : vector<8x128xf32> to vector<8x64xf32>
    %166 = arith.index_cast %137 : i32 to index
    %c64_54 = arith.constant 64 : index
    %167 = vector.load %arg4[%166, %c64_54] : memref<64x128xf32, #tpu.memory_space<vmem>>, vector<8x64xf32>
    tpu.vector_store %arg4[%166, %c64_54], %165 {strides = array<i32>} : memref<64x128xf32, #tpu.memory_space<vmem>>, vector<8x64xf32>,
    %c4_i32 = arith.constant 4 : i32
    %c7_i32_55 = arith.constant 7 : i32
    %168 = arith.subi %c7_i32_55, %c4_i32 : i32
    %c8_i32_56 = arith.constant 8 : i32
    %169 = arith.muli %c4_i32, %c8_i32_56 : i32
    %170 = tpu.assume_multiple %169, 8 : i32
    %c8_i32_57 = arith.constant 8 : i32
    %171 = arith.muli %168, %c8_i32_57 : i32
    %172 = tpu.assume_multiple %171, 8 : i32
    %c0_58 = arith.constant 0 : index
    %c0_59 = arith.constant 0 : index
    %173 = vector.load %arg2[%c0_58, %c0_59] : memref<128x512xf32, #tpu.memory_space<vmem>>, vector<128x512xf32>
    %cst_60 = arith.constant dense<0.000000e+00> : vector<8x512xf32>
    %174 = tpu.matmul %161, %173, %cst_60 {dimension_numbers = #tpu.dot_dimension_numbers<[1], [0], [0], [1], [0, 0, 1, 1], [], []>} : vector<8x128xf32>, vector<128x512xf32>, vector<8x512xf32> -> vector<8x512xf32>
    %175 = arith.index_cast %170 : i32 to index
    %c0_61 = arith.constant 0 : index
    %176 = vector.load %arg5[%175, %c0_61] : memref<64x512xf32, #tpu.memory_space<vmem>>, vector<8x512xf32>
    %177 = arith.index_cast %172 : i32 to index
    %c0_62 = arith.constant 0 : index
    %178 = vector.load %arg5[%177, %c0_62] : memref<64x512xf32, #tpu.memory_space<vmem>>, vector<8x512xf32>
    %179 = arith.select %25, %176, %178 : vector<8x512xi1>, vector<8x512xf32>
    %180 = arith.addf %174, %179 : vector<8x512xf32>
    %181 = vector.extract_strided_slice %180 {offsets = [0, 0], sizes = [8, 384], strides = [1, 1]} : vector<8x512xf32> to vector<8x384xf32>
    %182 = arith.negf %181 : vector<8x384xf32>
    %183 = math.exp %182 : vector<8x384xf32>
    %cst_63 = arith.constant 1.000000e+00 : f32
    %184 = vector.broadcast %cst_63 : f32 to vector<8x384xf32>
    %185 = arith.addf %184, %183 : vector<8x384xf32>
    %186 = arith.divf %184, %185 : vector<8x384xf32>
    %187 = vector.extract_strided_slice %180 {offsets = [0, 384], sizes = [8, 128], strides = [1, 1]} : vector<8x512xf32> to vector<8x128xf32>
    %188 = math.tanh %187 : vector<8x128xf32>
    %189 = vector.extract_strided_slice %186 {offsets = [0, 0], sizes = [8, 128], strides = [1, 1]} : vector<8x384xf32> to vector<8x128xf32>
    %190 = vector.extract_strided_slice %186 {offsets = [0, 128], sizes = [8, 128], strides = [1, 1]} : vector<8x384xf32> to vector<8x128xf32>
    %191 = vector.extract_strided_slice %186 {offsets = [0, 256], sizes = [8, 128], strides = [1, 1]} : vector<8x384xf32> to vector<8x128xf32>
    %192 = arith.mulf %190, %159 : vector<8x128xf32>
    %193 = arith.mulf %189, %188 : vector<8x128xf32>
    %194 = arith.addf %192, %193 : vector<8x128xf32>
    %195 = math.tanh %194 : vector<8x128xf32>
    %196 = arith.mulf %191, %195 : vector<8x128xf32>
    %197 = vector.extract_strided_slice %196 {offsets = [0, 0], sizes = [8, 64], strides = [1, 1]} : vector<8x128xf32> to vector<8x64xf32>
    %198 = arith.index_cast %170 : i32 to index
    %c0_64 = arith.constant 0 : index
    %199 = vector.load %arg4[%198, %c0_64] : memref<64x128xf32, #tpu.memory_space<vmem>>, vector<8x64xf32>
    tpu.vector_store %arg4[%198, %c0_64], %197 {strides = array<i32>} : memref<64x128xf32, #tpu.memory_space<vmem>>, vector<8x64xf32>,
    %200 = vector.extract_strided_slice %196 {offsets = [0, 64], sizes = [8, 64], strides = [1, 1]} : vector<8x128xf32> to vector<8x64xf32>
    %201 = arith.index_cast %172 : i32 to index
    %c64_65 = arith.constant 64 : index
    %202 = vector.load %arg4[%201, %c64_65] : memref<64x128xf32, #tpu.memory_space<vmem>>, vector<8x64xf32>
    tpu.vector_store %arg4[%201, %c64_65], %200 {strides = array<i32>} : memref<64x128xf32, #tpu.memory_space<vmem>>, vector<8x64xf32>,
    %c5_i32 = arith.constant 5 : i32
    %c7_i32_66 = arith.constant 7 : i32
    %203 = arith.subi %c7_i32_66, %c5_i32 : i32
    %c8_i32_67 = arith.constant 8 : i32
    %204 = arith.muli %c5_i32, %c8_i32_67 : i32
    %205 = tpu.assume_multiple %204, 8 : i32
    %c8_i32_68 = arith.constant 8 : i32
    %206 = arith.muli %203, %c8_i32_68 : i32
    %207 = tpu.assume_multiple %206, 8 : i32
    %c0_69 = arith.constant 0 : index
    %c0_70 = arith.constant 0 : index
    %208 = vector.load %arg2[%c0_69, %c0_70] : memref<128x512xf32, #tpu.memory_space<vmem>>, vector<128x512xf32>
    %cst_71 = arith.constant dense<0.000000e+00> : vector<8x512xf32>
    %209 = tpu.matmul %196, %208, %cst_71 {dimension_numbers = #tpu.dot_dimension_numbers<[1], [0], [0], [1], [0, 0, 1, 1], [], []>} : vector<8x128xf32>, vector<128x512xf32>, vector<8x512xf32> -> vector<8x512xf32>
    %210 = arith.index_cast %205 : i32 to index
    %c0_72 = arith.constant 0 : index
    %211 = vector.load %arg5[%210, %c0_72] : memref<64x512xf32, #tpu.memory_space<vmem>>, vector<8x512xf32>
    %212 = arith.index_cast %207 : i32 to index
    %c0_73 = arith.constant 0 : index
    %213 = vector.load %arg5[%212, %c0_73] : memref<64x512xf32, #tpu.memory_space<vmem>>, vector<8x512xf32>
    %214 = arith.select %25, %211, %213 : vector<8x512xi1>, vector<8x512xf32>
    %215 = arith.addf %209, %214 : vector<8x512xf32>
    %216 = vector.extract_strided_slice %215 {offsets = [0, 0], sizes = [8, 384], strides = [1, 1]} : vector<8x512xf32> to vector<8x384xf32>
    %217 = arith.negf %216 : vector<8x384xf32>
    %218 = math.exp %217 : vector<8x384xf32>
    %cst_74 = arith.constant 1.000000e+00 : f32
    %219 = vector.broadcast %cst_74 : f32 to vector<8x384xf32>
    %220 = arith.addf %219, %218 : vector<8x384xf32>
    %221 = arith.divf %219, %220 : vector<8x384xf32>
    %222 = vector.extract_strided_slice %215 {offsets = [0, 384], sizes = [8, 128], strides = [1, 1]} : vector<8x512xf32> to vector<8x128xf32>
    %223 = math.tanh %222 : vector<8x128xf32>
    %224 = vector.extract_strided_slice %221 {offsets = [0, 0], sizes = [8, 128], strides = [1, 1]} : vector<8x384xf32> to vector<8x128xf32>
    %225 = vector.extract_strided_slice %221 {offsets = [0, 128], sizes = [8, 128], strides = [1, 1]} : vector<8x384xf32> to vector<8x128xf32>
    %226 = vector.extract_strided_slice %221 {offsets = [0, 256], sizes = [8, 128], strides = [1, 1]} : vector<8x384xf32> to vector<8x128xf32>
    %227 = arith.mulf %225, %194 : vector<8x128xf32>
    %228 = arith.mulf %224, %223 : vector<8x128xf32>
    %229 = arith.addf %227, %228 : vector<8x128xf32>
    %230 = math.tanh %229 : vector<8x128xf32>
    %231 = arith.mulf %226, %230 : vector<8x128xf32>
    %232 = vector.extract_strided_slice %231 {offsets = [0, 0], sizes = [8, 64], strides = [1, 1]} : vector<8x128xf32> to vector<8x64xf32>
    %233 = arith.index_cast %205 : i32 to index
    %c0_75 = arith.constant 0 : index
    %234 = vector.load %arg4[%233, %c0_75] : memref<64x128xf32, #tpu.memory_space<vmem>>, vector<8x64xf32>
    tpu.vector_store %arg4[%233, %c0_75], %232 {strides = array<i32>} : memref<64x128xf32, #tpu.memory_space<vmem>>, vector<8x64xf32>,
    %235 = vector.extract_strided_slice %231 {offsets = [0, 64], sizes = [8, 64], strides = [1, 1]} : vector<8x128xf32> to vector<8x64xf32>
    %236 = arith.index_cast %207 : i32 to index
    %c64_76 = arith.constant 64 : index
    %237 = vector.load %arg4[%236, %c64_76] : memref<64x128xf32, #tpu.memory_space<vmem>>, vector<8x64xf32>
    tpu.vector_store %arg4[%236, %c64_76], %235 {strides = array<i32>} : memref<64x128xf32, #tpu.memory_space<vmem>>, vector<8x64xf32>,
    %c6_i32 = arith.constant 6 : i32
    %c7_i32_77 = arith.constant 7 : i32
    %238 = arith.subi %c7_i32_77, %c6_i32 : i32
    %c8_i32_78 = arith.constant 8 : i32
    %239 = arith.muli %c6_i32, %c8_i32_78 : i32
    %240 = tpu.assume_multiple %239, 8 : i32
    %c8_i32_79 = arith.constant 8 : i32
    %241 = arith.muli %238, %c8_i32_79 : i32
    %242 = tpu.assume_multiple %241, 8 : i32
    %c0_80 = arith.constant 0 : index
    %c0_81 = arith.constant 0 : index
    %243 = vector.load %arg2[%c0_80, %c0_81] : memref<128x512xf32, #tpu.memory_space<vmem>>, vector<128x512xf32>
    %cst_82 = arith.constant dense<0.000000e+00> : vector<8x512xf32>
    %244 = tpu.matmul %231, %243, %cst_82 {dimension_numbers = #tpu.dot_dimension_numbers<[1], [0], [0], [1], [0, 0, 1, 1], [], []>} : vector<8x128xf32>, vector<128x512xf32>, vector<8x512xf32> -> vector<8x512xf32>
    %245 = arith.index_cast %240 : i32 to index
    %c0_83 = arith.constant 0 : index
    %246 = vector.load %arg5[%245, %c0_83] : memref<64x512xf32, #tpu.memory_space<vmem>>, vector<8x512xf32>
    %247 = arith.index_cast %242 : i32 to index
    %c0_84 = arith.constant 0 : index
    %248 = vector.load %arg5[%247, %c0_84] : memref<64x512xf32, #tpu.memory_space<vmem>>, vector<8x512xf32>
    %249 = arith.select %25, %246, %248 : vector<8x512xi1>, vector<8x512xf32>
    %250 = arith.addf %244, %249 : vector<8x512xf32>
    %251 = vector.extract_strided_slice %250 {offsets = [0, 0], sizes = [8, 384], strides = [1, 1]} : vector<8x512xf32> to vector<8x384xf32>
    %252 = arith.negf %251 : vector<8x384xf32>
    %253 = math.exp %252 : vector<8x384xf32>
    %cst_85 = arith.constant 1.000000e+00 : f32
    %254 = vector.broadcast %cst_85 : f32 to vector<8x384xf32>
    %255 = arith.addf %254, %253 : vector<8x384xf32>
    %256 = arith.divf %254, %255 : vector<8x384xf32>
    %257 = vector.extract_strided_slice %250 {offsets = [0, 384], sizes = [8, 128], strides = [1, 1]} : vector<8x512xf32> to vector<8x128xf32>
    %258 = math.tanh %257 : vector<8x128xf32>
    %259 = vector.extract_strided_slice %256 {offsets = [0, 0], sizes = [8, 128], strides = [1, 1]} : vector<8x384xf32> to vector<8x128xf32>
    %260 = vector.extract_strided_slice %256 {offsets = [0, 128], sizes = [8, 128], strides = [1, 1]} : vector<8x384xf32> to vector<8x128xf32>
    %261 = vector.extract_strided_slice %256 {offsets = [0, 256], sizes = [8, 128], strides = [1, 1]} : vector<8x384xf32> to vector<8x128xf32>
    %262 = arith.mulf %260, %229 : vector<8x128xf32>
    %263 = arith.mulf %259, %258 : vector<8x128xf32>
    %264 = arith.addf %262, %263 : vector<8x128xf32>
    %265 = math.tanh %264 : vector<8x128xf32>
    %266 = arith.mulf %261, %265 : vector<8x128xf32>
    %267 = vector.extract_strided_slice %266 {offsets = [0, 0], sizes = [8, 64], strides = [1, 1]} : vector<8x128xf32> to vector<8x64xf32>
    %268 = arith.index_cast %240 : i32 to index
    %c0_86 = arith.constant 0 : index
    %269 = vector.load %arg4[%268, %c0_86] : memref<64x128xf32, #tpu.memory_space<vmem>>, vector<8x64xf32>
    tpu.vector_store %arg4[%268, %c0_86], %267 {strides = array<i32>} : memref<64x128xf32, #tpu.memory_space<vmem>>, vector<8x64xf32>,
    %270 = vector.extract_strided_slice %266 {offsets = [0, 64], sizes = [8, 64], strides = [1, 1]} : vector<8x128xf32> to vector<8x64xf32>
    %271 = arith.index_cast %242 : i32 to index
    %c64_87 = arith.constant 64 : index
    %272 = vector.load %arg4[%271, %c64_87] : memref<64x128xf32, #tpu.memory_space<vmem>>, vector<8x64xf32>
    tpu.vector_store %arg4[%271, %c64_87], %270 {strides = array<i32>} : memref<64x128xf32, #tpu.memory_space<vmem>>, vector<8x64xf32>,
    %c7_i32_88 = arith.constant 7 : i32
    %c7_i32_89 = arith.constant 7 : i32
    %273 = arith.subi %c7_i32_89, %c7_i32_88 : i32
    %c8_i32_90 = arith.constant 8 : i32
    %274 = arith.muli %c7_i32_88, %c8_i32_90 : i32
    %275 = tpu.assume_multiple %274, 8 : i32
    %c8_i32_91 = arith.constant 8 : i32
    %276 = arith.muli %273, %c8_i32_91 : i32
    %277 = tpu.assume_multiple %276, 8 : i32
    %c0_92 = arith.constant 0 : index
    %c0_93 = arith.constant 0 : index
    %278 = vector.load %arg2[%c0_92, %c0_93] : memref<128x512xf32, #tpu.memory_space<vmem>>, vector<128x512xf32>
    %cst_94 = arith.constant dense<0.000000e+00> : vector<8x512xf32>
    %279 = tpu.matmul %266, %278, %cst_94 {dimension_numbers = #tpu.dot_dimension_numbers<[1], [0], [0], [1], [0, 0, 1, 1], [], []>} : vector<8x128xf32>, vector<128x512xf32>, vector<8x512xf32> -> vector<8x512xf32>
    %280 = arith.index_cast %275 : i32 to index
    %c0_95 = arith.constant 0 : index
    %281 = vector.load %arg5[%280, %c0_95] : memref<64x512xf32, #tpu.memory_space<vmem>>, vector<8x512xf32>
    %282 = arith.index_cast %277 : i32 to index
    %c0_96 = arith.constant 0 : index
    %283 = vector.load %arg5[%282, %c0_96] : memref<64x512xf32, #tpu.memory_space<vmem>>, vector<8x512xf32>
    %284 = arith.select %25, %281, %283 : vector<8x512xi1>, vector<8x512xf32>
    %285 = arith.addf %279, %284 : vector<8x512xf32>
    %286 = vector.extract_strided_slice %285 {offsets = [0, 0], sizes = [8, 384], strides = [1, 1]} : vector<8x512xf32> to vector<8x384xf32>
    %287 = arith.negf %286 : vector<8x384xf32>
    %288 = math.exp %287 : vector<8x384xf32>
    %cst_97 = arith.constant 1.000000e+00 : f32
    %289 = vector.broadcast %cst_97 : f32 to vector<8x384xf32>
    %290 = arith.addf %289, %288 : vector<8x384xf32>
    %291 = arith.divf %289, %290 : vector<8x384xf32>
    %292 = vector.extract_strided_slice %285 {offsets = [0, 384], sizes = [8, 128], strides = [1, 1]} : vector<8x512xf32> to vector<8x128xf32>
    %293 = math.tanh %292 : vector<8x128xf32>
    %294 = vector.extract_strided_slice %291 {offsets = [0, 0], sizes = [8, 128], strides = [1, 1]} : vector<8x384xf32> to vector<8x128xf32>
    %295 = vector.extract_strided_slice %291 {offsets = [0, 128], sizes = [8, 128], strides = [1, 1]} : vector<8x384xf32> to vector<8x128xf32>
    %296 = vector.extract_strided_slice %291 {offsets = [0, 256], sizes = [8, 128], strides = [1, 1]} : vector<8x384xf32> to vector<8x128xf32>
    %297 = arith.mulf %295, %264 : vector<8x128xf32>
    %298 = arith.mulf %294, %293 : vector<8x128xf32>
    %299 = arith.addf %297, %298 : vector<8x128xf32>
    %300 = math.tanh %299 : vector<8x128xf32>
    %301 = arith.mulf %296, %300 : vector<8x128xf32>
    %302 = vector.extract_strided_slice %301 {offsets = [0, 0], sizes = [8, 64], strides = [1, 1]} : vector<8x128xf32> to vector<8x64xf32>
    %303 = arith.index_cast %275 : i32 to index
    %c0_98 = arith.constant 0 : index
    %304 = vector.load %arg4[%303, %c0_98] : memref<64x128xf32, #tpu.memory_space<vmem>>, vector<8x64xf32>
    tpu.vector_store %arg4[%303, %c0_98], %302 {strides = array<i32>} : memref<64x128xf32, #tpu.memory_space<vmem>>, vector<8x64xf32>,
    %305 = vector.extract_strided_slice %301 {offsets = [0, 64], sizes = [8, 64], strides = [1, 1]} : vector<8x128xf32> to vector<8x64xf32>
    %306 = arith.index_cast %277 : i32 to index
    %c64_99 = arith.constant 64 : index
    %307 = vector.load %arg4[%306, %c64_99] : memref<64x128xf32, #tpu.memory_space<vmem>>, vector<8x64xf32>
    tpu.vector_store %arg4[%306, %c64_99], %305 {strides = array<i32>} : memref<64x128xf32, #tpu.memory_space<vmem>>, vector<8x64xf32>,
    %c8_i32_100 = arith.constant 8 : i32
    return
  }
}

</mosaic_0001>

<bundles_post_ra>
// kernel: tpu_custom_call.1
= control target key start
LH: loop header
LB: loop body
LE: loop exit
PB: predicated region body
PF: predicated region fallthrough
CT: control target
= control target key end

     0   :  { %9 = vsyncpa [#allocation4], 0  ;;  %s4116_s0 = inlined_call_operand.vmem [shape: f32[64,32], index: 0, kind: input, shape index: {}]   ;;  %s4117_s1 = inlined_call_operand.hbm [shape: f32[32,512], index: 1, kind: input, shape index: {}]   ;;  %s4118_s2 = inlined_call_operand.hbm [shape: f32[128,512], index: 2, kind: input, shape index: {}]   ;;  %s4119_s3 = inlined_call_operand.vmem [shape: f32[1,512], index: 3, kind: input, shape index: {}]   ;;  %s4120_s4 = inlined_call_operand.hbm [shape: f32[64,128], index: 4, kind: output, shape index: {}]  }
   0x1   :  { %10 = vsyncpa [#allocation7], 0 }
   0x2   :  { %11 = vsyncpa [#allocation5], 0  ;;  %s3218_s15 = smov [#allocation3]   ;;  %s3146_s19 = scalar_lea.hbm %s4117_s1, 2048 }
   0x3   :  { %s19_s16 = sshll.u32 %s3218_s15, 4  ;;  %p3147_p0 = scmp.ne.s32.totalorder %s4117_s1, %s3146_s19  ;;  %s20_s16 = int_to_ptr.vmem [resolvable:$true] %s19_s16 }
   0x4   :  { %p3150_p1 = scmp.lt.u32.totalorder %s3146_s19, %s4117_s1 }
   0x6   :  { %p3152_p2 = pnand %p3150_p1, %p3147_p0 }
   0x8   :  { %3155 = shalt.err (!%p3152_p2)
}
   0x9   :  { %s3156_s24 = scalar_lea.vmem %s20_s16, 2048  ;;  %p3161_p4 = scmp.lt.s32.totalorder %s20_s16, %s20_s16 }
   0xa   :  { %p3157_p3 = scmp.ne.s32.totalorder %s20_s16, %s3156_s24  ;;  %p3162_p5 = scmp.lt.s32.totalorder %s3156_s24, %s3156_s24 }
   0xc   :  { %p3163_p6 = por %p3162_p5, %p3161_p4 }
   0xe   :  { %p3164_p7 = pnand %p3163_p6, %p3157_p3 }
  0x10   :  { %3167 = shalt.err (!%p3164_p7)
}
  0x11   :  { %s3219_s25 = smov 512   ;;  %s3220_s26 = smov 32  }
  0x12   :  { %25 = dma.hbm_to_vmem [thread:$0]  %s4117_s1, 2048, %s20_s16, [#allocation4], %s3219_s25, %s3219_s25, %s3220_s26  }
  0x13   :  { %s3221_s29 = smov [#allocation6]   ;;  %s3168_s7 = scalar_lea.hbm %s4118_s2, 8192 }
  0x14   :  { %s31_s30 = sshll.u32 %s3221_s29, 4  ;;  %p3169_p8 = scmp.ne.s32.totalorder %s4118_s2, %s3168_s7  ;;  %s32_s30 = int_to_ptr.vmem [resolvable:$true] %s31_s30 }
  0x15   :  { %p3172_p9 = scmp.lt.u32.totalorder %s3168_s7, %s4118_s2 }
  0x17   :  { %p3174_p10 = pnand %p3172_p9, %p3169_p8 }
  0x19   :  { %3177 = shalt.err (!%p3174_p10)
}
  0x1a   :  { %s3178_s12 = scalar_lea.vmem %s32_s30, 8192  ;;  %p3183_p12 = scmp.lt.s32.totalorder %s32_s30, %s32_s30 }
  0x1b   :  { %p3179_p11 = scmp.ne.s32.totalorder %s32_s30, %s3178_s12  ;;  %p3184_p13 = scmp.lt.s32.totalorder %s3178_s12, %s3178_s12 }
  0x1d   :  { %p3185_p0 = por %p3184_p13, %p3183_p12 }
  0x1f   :  { %p3186_p1 = pnand %p3185_p0, %p3179_p11 }
  0x21   :  { %3189 = shalt.err (!%p3186_p1)
}
  0x22   :  { %37 = dma.hbm_to_vmem [thread:$0]  %s4118_s2, 8192, %s32_s30, [#allocation7], %s3219_s25, %s3219_s25, %s3220_s26  }
  0x23   :  { %3212 = dma.done.wait [#allocation4], 2048  }
  0x24   :  { %3213 = vsyncadd [#allocation4], 4294965248 }
  0x25   :  { %3214 = dma.done.wait [#allocation7], 8192  }
  0x26   :  { %3215 = vsyncadd [#allocation7], 4294959104  ;;  %v4121_v0 = vmov 0.0   ;;  %v55_v1 = vld [vmem:[#allocation3 + $0x8] sm:$0xff]  ;;  %v57_v3 = vld [vmem:[#allocation3 + $0x18] sm:$0xff]  ;;  %vm92_vm0 = vcmask 261120  }
  0x27   :  { %181 = vmatprep.mubr.f32.mxu0 %v4121_v0  ;;  %294 = vmatprep.mubr.f32.mxu1 %v4121_v0  ;;  %v59_v2 = vld [vmem:[#allocation3 + $0x28] sm:$0xff]  ;;  %v61_v5 = vld [vmem:[#allocation3 + $0x38] sm:$0xff]  ;;  %v54_v6 = vld [vmem:[#allocation3] sm:$0xff]  ;;  %vm680_vm5 = vcmask 523264   ;;  %vm683_vm6 = vcmask 1048064  }
  0x28   :  { %v2482_v4 = vpack.c.bf16 %v59_v2, %v55_v1  ;;  %v58_v7 = vld [vmem:[#allocation3 + $0x20] sm:$0xff]  ;;  %v2490_v8 = vpack.c.bf16 %v61_v5, %v57_v3  ;;  %v56_v10 = vld [vmem:[#allocation3 + $0x10] sm:$0xff]  ;;  %v63_v12 = vld [vmem:[#allocation3 + $0x48] sm:$0xff] }
  0x29   :  { %v2484_v9 = vpack.c.bf16 %v58_v7, %v54_v6  ;;  %v60_v11 = vld [vmem:[#allocation3 + $0x30] sm:$0xff]  ;;  %v67_v14 = vld [vmem:[#allocation3 + $0x68] sm:$0xff]  ;;  %v65_v15 = vld [vmem:[#allocation3 + $0x58] sm:$0xff] }
  0x2a   :  { %2483 = vmatprep.subr.bf16.mxu0 %v2482_v4  ;;  %v2492_v13 = vpack.c.bf16 %v60_v11, %v56_v10  ;;  %v69_v16 = vld [vmem:[#allocation3 + $0x78] sm:$0xff]  ;;  %2491 = vmatprep.subr.bf16.mxu1 %v2490_v8  ;;  %v2486_v17 = vpack.c.bf16 %v67_v14, %v63_v12  ;;  %v62_v19 = vld [vmem:[#allocation3 + $0x40] sm:$0xff]  ;;  %v64_v21 = vld [vmem:[#allocation3 + $0x50] sm:$0xff] }
  0x2b   :  { %2485 = vmatpush1.bf16.msra.mxu0 %v2484_v9  ;;  %v2494_v18 = vpack.c.bf16 %v69_v16, %v65_v15  ;;  %v66_v20 = vld [vmem:[#allocation3 + $0x60] sm:$0xff]  ;;  %v68_v23 = vld [vmem:[#allocation3 + $0x70] sm:$0xff]  ;;  %v433_v24 = vld [vmem:[#allocation6 + $0x8] sm:$0xff] }
  0x2c   :  { %2493 = vmatpush1.bf16.msra.mxu1 %v2492_v13  ;;  %v2488_v22 = vpack.c.bf16 %v66_v20, %v62_v19  ;;  %2487 = vmatprep.subr.bf16.mxu0 %v2486_v17  ;;  %v2496_v25 = vpack.c.bf16 %v68_v23, %v64_v21  ;;  %v437_v26 = vld [vmem:[#allocation6 + $0x28] sm:$0xff]  ;;  %v435_v27 = vld [vmem:[#allocation6 + $0x18] sm:$0xff]  ;;  %v432_v31 = vld [vmem:[#allocation6] sm:$0xff] }
  0x2d   :  { %2495 = vmatprep.subr.bf16.mxu1 %v2494_v18  ;;  %v439_v28 = vld [vmem:[#allocation6 + $0x38] sm:$0xff]  ;;  %v3277_v29 = vpack.c.bf16 %v437_v26, %v433_v24  ;;  %v436_v32 = vld [vmem:[#allocation6 + $0x20] sm:$0xff]  ;;  %v434_v33 = vld [vmem:[#allocation6 + $0x10] sm:$0xff] }
  0x2e   :  { %v3279_v30 = vpack.c.bf16 %v439_v28, %v435_v27  ;;  %v46_v34 = vld [vmem:[%s4116_s0] sm:$0xff]  ;;  %v3284_v35 = vpack.c.bf16 %v436_v32, %v432_v31  ;;  %v438_v36 = vld [vmem:[#allocation6 + $0x30] sm:$0xff]  ;;  %v441_v37 = vld [vmem:[#allocation6 + $0x48] sm:$0xff] }
  0x2f   :  { %2489 = vmatpush1.bf16.msra.mxu0 %v2488_v22  ;;  %v3287_v38 = vpack.c.bf16 %v438_v36, %v434_v33  ;;  %v445_v39 = vld [vmem:[#allocation6 + $0x68] sm:$0xff]  ;;  %v443_v40 = vld [vmem:[#allocation6 + $0x58] sm:$0xff]  ;;  %v440_v43 = vld [vmem:[#allocation6 + $0x40] sm:$0xff] }
  0x30   :  { %2497 = vmatpush1.bf16.msra.mxu1 %v2496_v25  ;;  %2499 = vmatprep.subr.bf16.mxu0 %v3277_v29  ;;  %v447_v41 = vld [vmem:[#allocation6 + $0x78] sm:$0xff]  ;;  %v3290_v42 = vpack.c.bf16 %v445_v39, %v441_v37  ;;  %v444_v44 = vld [vmem:[#allocation6 + $0x60] sm:$0xff]  ;;  %v442_v45 = vld [vmem:[#allocation6 + $0x50] sm:$0xff] }
  0x31   :  { %2531 = vmatprep.subr.bf16.mxu1 %v3279_v30  ;;  %v47_v46 = vld [vmem:[%s4116_s0 + $0x8] sm:$0xff]  ;;  %v3296_v47 = vpack.c.bf16 %v447_v41, %v443_v40  ;;  %v446_v48 = vld [vmem:[#allocation6 + $0x70] sm:$0xff]  ;;  %v3300_v50 = vpack.c.bf16 %v444_v44, %v440_v43  ;;  %v451_v52 = vld [vmem:[#allocation6 + $0x98] sm:$0xff] }
  0x32   :  { %2442 = vmatmul.mubr.msk.f32.vlgmr.msra.gmra.mrb[0].mxu0 %vm92_vm0, %v46_v34  ;;  %v449_v49 = vld [vmem:[#allocation6 + $0x88] sm:$0xff]  ;;  %v455_v53 = vld [vmem:[#allocation6 + $0xb8] sm:$0xff]  ;;  %v3304_v54 = vpack.c.bf16 %v446_v48, %v442_v45  ;;  %v448_v55 = vld [vmem:[#allocation6 + $0x80] sm:$0xff] }
  0x33   :  { %2450 = vmatmul.mubr.msk.f32.vlgmr.msra.gmra.mrb[0].mxu1 %vm92_vm0, %v46_v34  ;;  %2501 = vmatpush1.bf16.msra.mxu0 %v3284_v35  ;;  %v453_v51 = vld [vmem:[#allocation6 + $0xa8] sm:$0xff]  ;;  %v452_v56 = vld [vmem:[#allocation6 + $0xa0] sm:$0xff]  ;;  %v450_v58 = vld [vmem:[#allocation6 + $0x90] sm:$0xff]  ;;  %v3312_v60 = vpack.c.bf16 %v455_v53, %v451_v52 }
  0x34   :  { %2533 = vmatpush1.bf16.msra.mxu1 %v3287_v38  ;;  %187 = vmatprep.mubr.f32.mxu0 %v4121_v0  ;;  %v3308_v57 = vpack.c.bf16 %v453_v51, %v449_v49  ;;  %v454_v59 = vld [vmem:[#allocation6 + $0xb0] sm:$0xff]  ;;  %v457_v61 = vld [vmem:[#allocation6 + $0xc8] sm:$0xff]  ;;  %v3319_v1 = vpack.c.bf16 %v452_v56, %v448_v55  ;;  %v459_v2 = vld [vmem:[#allocation6 + $0xd8] sm:$0xff] }
  0x35   :  { %300 = vmatprep.mubr.f32.mxu1 %v4121_v0  ;;  %2503 = vmatprep.subr.bf16.mxu0 %v3290_v42  ;;  %v461_v62 = vld [vmem:[#allocation6 + $0xe8] sm:$0xff]  ;;  %v48_v63 = vld [vmem:[%s4116_s0 + $0x10] sm:$0xff]  ;;  %v463_v3 = vld [vmem:[#allocation6 + $0xf8] sm:$0xff]  ;;  %v3323_v4 = vpack.c.bf16 %v454_v59, %v450_v58 }
  0x36   :  { %2443 = vmatmul.mubr.msk.f32.gmra.mrb[2].mxu0 %vm92_vm0, %v47_v46  ;;  %2535 = vmatprep.subr.bf16.mxu1 %v3296_v47  ;;  %v456_v5 = vld [vmem:[#allocation6 + $0xc0] sm:$0xff]  ;;  %v3327_v7 = vpack.c.bf16 %v461_v62, %v457_v61  ;;  %v458_v8 = vld [vmem:[#allocation6 + $0xd0] sm:$0xff]  ;;  %v3331_v10 = vpack.c.bf16 %v463_v3, %v459_v2  ;;  %v465_v11 = vld [vmem:[#allocation6 + $0x108] sm:$0xff] }
  0x37   :  { %2451 = vmatmul.mubr.msk.f32.gmra.mrb[2].mxu1 %vm92_vm0, %v47_v46  ;;  %2505 = vmatpush1.bf16.msra.mxu0 %v3300_v50  ;;  %v460_v6 = vld [vmem:[#allocation6 + $0xe0] sm:$0xff]  ;;  %v462_v9 = vld [vmem:[#allocation6 + $0xf0] sm:$0xff]  ;;  %v469_v12 = vld [vmem:[#allocation6 + $0x128] sm:$0xff] }
  0x38   :  { %2537 = vmatpush1.bf16.msra.mxu1 %v3304_v54  ;;  %193 = vmatprep.mubr.f32.mxu0 %v4121_v0  ;;  %v49_v13 = vld [vmem:[%s4116_s0 + $0x18] sm:$0xff]  ;;  %v3338_v14 = vpack.c.bf16 %v460_v6, %v456_v5  ;;  %v3342_v17 = vpack.c.bf16 %v462_v9, %v458_v8  ;;  %v464_v18 = vld [vmem:[#allocation6 + $0x100] sm:$0xff]  ;;  %v3346_v20 = vpack.c.bf16 %v469_v12, %v465_v11  ;;  %v466_v21 = vld [vmem:[#allocation6 + $0x110] sm:$0xff] }
  0x39   :  { %306 = vmatprep.mubr.f32.mxu1 %v4121_v0  ;;  %2507 = vmatprep.subr.bf16.mxu0 %v3308_v57  ;;  %v467_v15 = vld [vmem:[#allocation6 + $0x118] sm:$0xff]  ;;  %v468_v19 = vld [vmem:[#allocation6 + $0x120] sm:$0xff]  ;;  %v470_v22 = vld [vmem:[#allocation6 + $0x130] sm:$0xff] }
  0x3a   :  { %2444 = vmatmul.mubr.msk.f32.gmra.mrb[4].mxu0 %vm92_vm0, %v48_v63  ;;  %2539 = vmatprep.subr.bf16.mxu1 %v3312_v60  ;;  %v471_v16 = vld [vmem:[#allocation6 + $0x138] sm:$0xff]  ;;  %v473_v24 = vld [vmem:[#allocation6 + $0x148] sm:$0xff]  ;;  %v50_v26 = vld [vmem:[%s4116_s0 + $0x20] sm:$0xff]  ;;  %v3357_v27 = vpack.c.bf16 %v468_v19, %v464_v18  ;;  %v3361_v32 = vpack.c.bf16 %v470_v22, %v466_v21  ;;  %v72_v19 = vlaneseq }
  0x3b   :  { %2452 = vmatmul.mubr.msk.f32.gmra.mrb[4].mxu1 %vm92_vm0, %v48_v63  ;;  %2509 = vmatpush1.bf16.msra.mxu0 %v3319_v1  ;;  %v3350_v23 = vpack.c.bf16 %v471_v16, %v467_v15  ;;  %v477_v25 = vld [vmem:[#allocation6 + $0x168] sm:$0xff]  ;;  %v475_v28 = vld [vmem:[#allocation6 + $0x158] sm:$0xff]  ;;  %v472_v33 = vld [vmem:[#allocation6 + $0x140] sm:$0xff] }
  0x3c   :  { %2541 = vmatpush1.bf16.msra.mxu1 %v3323_v4  ;;  %199 = vmatprep.mubr.f32.mxu0 %v4121_v0  ;;  %v479_v31 = vld [vmem:[#allocation6 + $0x178] sm:$0xff]  ;;  %v476_v34 = vld [vmem:[#allocation6 + $0x160] sm:$0xff]  ;;  %v3365_v36 = vpack.c.bf16 %v477_v25, %v473_v24  ;;  %v474_v37 = vld [vmem:[#allocation6 + $0x150] sm:$0xff]  ;;  %v73_v21 = vshrl.u32 %v72_v19, 7 }
  0x3d   :  { %312 = vmatprep.mubr.f32.mxu1 %v4121_v0  ;;  %2511 = vmatprep.subr.bf16.mxu0 %v3327_v7  ;;  %v478_v39 = vld [vmem:[#allocation6 + $0x170] sm:$0xff]  ;;  %v3369_v40 = vpack.c.bf16 %v479_v31, %v475_v28  ;;  %v481_v41 = vld [vmem:[#allocation6 + $0x188] sm:$0xff]  ;;  %v3376_v45 = vpack.c.bf16 %v476_v34, %v472_v33  ;;  %v483_v46 = vld [vmem:[#allocation6 + $0x198] sm:$0xff] }
  0x3e   :  { %2445 = vmatmul.mubr.msk.f32.gmra.mrb[6].mxu0 %vm92_vm0, %v49_v13  ;;  %2543 = vmatprep.subr.bf16.mxu1 %v3331_v10  ;;  %v485_v43 = vld [vmem:[#allocation6 + $0x1a8] sm:$0xff]  ;;  %v487_v48 = vld [vmem:[#allocation6 + $0x1b8] sm:$0xff]  ;;  %v3380_v49 = vpack.c.bf16 %v478_v39, %v474_v37  ;;  %v480_v51 = vld [vmem:[#allocation6 + $0x180] sm:$0xff]  ;;  %v74_v22 = vsub.s32 0, %v73_v21  ;;  %v82_v28 = vsub.s32 2, %v73_v21  ;;  %v86_v34 = vsub.s32 3, %v73_v21 }
  0x3f   :  { %2453 = vmatmul.mubr.msk.f32.gmra.mrb[6].mxu1 %vm92_vm0, %v49_v13  ;;  %2513 = vmatpush1.bf16.msra.mxu0 %v3338_v14  ;;  %v51_v44 = vld [vmem:[%s4116_s0 + $0x28] sm:$0xff]  ;;  %v484_v52 = vld [vmem:[#allocation6 + $0x1a0] sm:$0xff]  ;;  %v3384_v53 = vpack.c.bf16 %v485_v43, %v481_v41  ;;  %v482_v55 = vld [vmem:[#allocation6 + $0x190] sm:$0xff]  ;;  %v3388_v58 = vpack.c.bf16 %v487_v48, %v483_v46 }
  0x40   :  { %2545 = vmatpush1.bf16.msra.mxu1 %v3342_v17  ;;  %205 = vmatprep.mubr.f32.mxu0 %v4121_v0  ;;  %v486_v56 = vld [vmem:[#allocation6 + $0x1b0] sm:$0xff]  ;;  %v489_v59 = vld [vmem:[#allocation6 + $0x1c8] sm:$0xff]  ;;  %v3395_v63 = vpack.c.bf16 %v484_v52, %v480_v51  ;;  %v491_v2 = vld [vmem:[#allocation6 + $0x1d8] sm:$0xff]  ;;  %v3489_v51 = vand.u32 127, %v72_v19 }
  0x41   :  { %318 = vmatprep.mubr.f32.mxu1 %v4121_v0  ;;  %2515 = vmatprep.subr.bf16.mxu0 %v3346_v20  ;;  %v493_v61 = vld [vmem:[#allocation6 + $0x1e8] sm:$0xff]  ;;  %v52_v62 = vld [vmem:[%s4116_s0 + $0x30] sm:$0xff]  ;;  %v495_v3 = vld [vmem:[#allocation6 + $0x1f8] sm:$0xff]  ;;  %v3399_v5 = vpack.c.bf16 %v486_v56, %v482_v55 }
  0x42   :  { %2446 = vmatmul.mubr.msk.f32.gmra.mrb[8].mxu0 %vm92_vm0, %v50_v26  ;;  %2547 = vmatprep.subr.bf16.mxu1 %v3350_v23  ;;  %v488_v6 = vld [vmem:[#allocation6 + $0x1c0] sm:$0xff]  ;;  %v3403_v9 = vpack.c.bf16 %v493_v61, %v489_v59  ;;  %v490_v11 = vld [vmem:[#allocation6 + $0x1d0] sm:$0xff]  ;;  %v3407_v13 = vpack.c.bf16 %v495_v3, %v491_v2  ;;  %v53_v15 = vld [vmem:[%s4116_s0 + $0x38] sm:$0xff]  ;;  %vm428_vm1 = vcmp.lt.s32.totalorder %v3489_v51, 64 }
  0x43   :  { %2454 = vmatmul.mubr.msk.f32.gmra.mrb[8].mxu1 %vm92_vm0, %v50_v26  ;;  %2517 = vmatpush1.bf16.msra.mxu0 %v3357_v27  ;;  %v492_v8 = vld [vmem:[#allocation6 + $0x1e0] sm:$0xff]  ;;  %v494_v12 = vld [vmem:[#allocation6 + $0x1f0] sm:$0xff]  ;;  %v78_v26 = vsub.s32 1, %v73_v21  ;;  %v379_v21 = vadd.s32 384, %v3489_v51 }
  0x44   :  { %2549 = vmatpush1.bf16.msra.mxu1 %v3361_v32  ;;  %211 = vmatprep.mubr.f32.mxu0 %v4121_v0  ;;  %v3414_v16 = vpack.c.bf16 %v492_v8, %v488_v6  ;;  %v3418_v18 = vpack.c.bf16 %v494_v12, %v490_v11  ;;  %v70_v24 = vld [vmem:[%s4119_s3] sm:$0xf]  ;;  %v377_v6 = vadd.s32 128, %v3489_v51  ;;  %s3223_s3 = smov [#allocation8]  }
  0x45   :  { %324 = vmatprep.mubr.f32.mxu1 %v4121_v0  ;;  %2519 = vmatprep.subr.bf16.mxu0 %v3365_v36  ;;  %v3482_v41 = vrot.slane %v70_v24, %v82_v28  ;;  %v3487_v46 = vrot.slane %v70_v24, %v86_v34  ;;  %s2422_s30 = sshll.u32 %s3223_s3, 4  ;;  %s2423_s30 = int_to_ptr.vmem [resolvable:$true] %s2422_s30 }
  0x46   :  { %2447 = vmatmul.mubr.msk.f32.gmra.mrb[10].mxu0 %vm92_vm0, %v51_v44  ;;  %2551 = vmatprep.subr.bf16.mxu1 %v3369_v40  ;;  %v391_v34 = vand.u32 127, %v377_v6  ;;  %s3190_s5 = scalar_lea.vmem %s2423_s30, 1024  ;;  %p3195_p3 = scmp.lt.s32.totalorder %s2423_s30, %s2423_s30 }
  0x47   :  { %2455 = vmatmul.mubr.msk.f32.gmra.mrb[10].mxu1 %vm92_vm0, %v51_v44  ;;  %2521 = vmatpush1.bf16.msra.mxu0 %v3376_v45  ;;  %p3191_p2 = scmp.ne.s32.totalorder %s2423_s30, %s3190_s5  ;;  %p3196_p4 = scmp.lt.s32.totalorder %s3190_s5, %s3190_s5 }
  0x48   :  { %2553 = vmatpush1.bf16.msra.mxu1 %v3380_v49  ;;  %217 = vmatprep.mubr.f32.mxu0 %v4121_v0  ;;  %vm3525_vm2 = vcmp.lt.s32.totalorder %v391_v34, 64 }
  0x49   :  { %330 = vmatprep.mubr.f32.mxu1 %v4121_v0  ;;  %2523 = vmatprep.subr.bf16.mxu0 %v3384_v53  ;;  %p3197_p5 = por %p3196_p4, %p3195_p3 }
  0x4a   :  { %2448 = vmatmul.mubr.msk.f32.gmra.mrb[12].mxu0 %vm92_vm0, %v52_v62  ;;  %2555 = vmatprep.subr.bf16.mxu1 %v3388_v58 }
  0x4b   :  { %2456 = vmatmul.mubr.msk.f32.gmra.mrb[12].mxu1 %vm92_vm0, %v52_v62  ;;  %2525 = vmatpush1.bf16.msra.mxu0 %v3395_v63  ;;  %p3198_p6 = pnand %p3197_p5, %p3191_p2 }
  0x4c   :  { %2557 = vmatpush1.bf16.msra.mxu1 %v3399_v5  ;;  %223 = vmatprep.mubr.f32.mxu0 %v4121_v0 }
  0x4d   :  { %336 = vmatprep.mubr.f32.mxu1 %v4121_v0  ;;  %2527 = vmatprep.subr.bf16.mxu0 %v3403_v9 }
  0x4e   :  { %2449 = vmatmul.mubr.msk.f32.gmra.mrb[14].mxu0 %vm92_vm0, %v53_v15  ;;  %2559 = vmatprep.subr.bf16.mxu1 %v3407_v13 }
  0x4f   :  { %2457 = vmatmul.mubr.msk.f32.gmra.mrb[14].mxu1 %vm92_vm0, %v53_v15  ;;  %2529 = vmatpush1.bf16.msra.mxu0 %v3414_v16  ;;  %v378_v15 = vadd.s32 256, %v3489_v51 }
  0x50   :  { %2561 = vmatpush1.bf16.msra.mxu1 %v3418_v18  ;;  %578 = vmatprep.mubr.f32.mxu0 %v4121_v0 }
  0x51   :  { %649 = vmatprep.mubr.f32.mxu1 %v4121_v0  ;;  %2563 = vmatprep.subr.bf16.mxu0 %v3277_v29 }
  0x52   :  { %579 = vmatmul.mubr.f32.vlgmr.msra.gmra.mrb[16].mxu0 %v4121_v0  ;;  %2595 = vmatprep.subr.bf16.mxu1 %v3279_v30 }
  0x53   :  { %650 = vmatmul.mubr.f32.vlgmr.msra.gmra.mrb[16].mxu1 %v4121_v0  ;;  %2565 = vmatpush1.bf16.msra.mxu0 %v3284_v35 }
  0x54   :  { %2597 = vmatpush1.bf16.msra.mxu1 %v3287_v38  ;;  %2567 = vmatprep.subr.bf16.mxu0 %v3290_v42 }
  0x55   :  { %2599 = vmatprep.subr.bf16.mxu1 %v3296_v47  ;;  %831 = vmatprep.mubr.f32.mxu0 %v4121_v0 }
  0x56   :  { %902 = vmatprep.mubr.f32.mxu1 %v4121_v0 }
  0x57   :  { %2569 = vmatpush1.bf16.msra.mxu0 %v3300_v50 }
  0x58   :  { %2601 = vmatpush1.bf16.msra.mxu1 %v3304_v54  ;;  %2571 = vmatprep.subr.bf16.mxu0 %v3308_v57 }
  0x59   :  { %2603 = vmatprep.subr.bf16.mxu1 %v3312_v60 }
  0x5b   :  { %2573 = vmatpush1.bf16.msra.mxu0 %v3319_v1 }
  0x5c   :  { %2605 = vmatpush1.bf16.msra.mxu1 %v3323_v4  ;;  %2575 = vmatprep.subr.bf16.mxu0 %v3327_v7 }
  0x5d   :  { %2607 = vmatprep.subr.bf16.mxu1 %v3331_v10 }
  0x5f   :  { %2577 = vmatpush1.bf16.msra.mxu0 %v3338_v14 }
  0x60   :  { %2609 = vmatpush1.bf16.msra.mxu1 %v3342_v17  ;;  %2579 = vmatprep.subr.bf16.mxu0 %v3346_v20 }
  0x61   :  { %2611 = vmatprep.subr.bf16.mxu1 %v3350_v23 }
  0x63   :  { %2581 = vmatpush1.bf16.msra.mxu0 %v3357_v27 }
  0x64   :  { %2613 = vmatpush1.bf16.msra.mxu1 %v3361_v32  ;;  %2583 = vmatprep.subr.bf16.mxu0 %v3365_v36 }
  0x65   :  { %2615 = vmatprep.subr.bf16.mxu1 %v3369_v40 }
  0x67   :  { %2585 = vmatpush1.bf16.msra.mxu0 %v3376_v45 }
  0x68   :  { %2617 = vmatpush1.bf16.msra.mxu1 %v3380_v49  ;;  %2587 = vmatprep.subr.bf16.mxu0 %v3384_v53 }
  0x69   :  { %2619 = vmatprep.subr.bf16.mxu1 %v3388_v58 }
  0x6b   :  { %2589 = vmatpush1.bf16.msra.mxu0 %v3395_v63 }
  0x6c   :  { %2621 = vmatpush1.bf16.msra.mxu1 %v3399_v5  ;;  %2591 = vmatprep.subr.bf16.mxu0 %v3403_v9 }
  0x6d   :  { %2623 = vmatprep.subr.bf16.mxu1 %v3407_v13 }
  0x6f   :  { %2593 = vmatpush1.bf16.msra.mxu0 %v3414_v16 }
  0x70   :  { %2625 = vmatpush1.bf16.msra.mxu1 %v3418_v18  ;;  %2627 = vmatprep.subr.bf16.mxu0 %v3277_v29  ;;  %v3478_v29 = vrot.slane %v70_v24, %v74_v22 }
  0x71   :  { %2659 = vmatprep.subr.bf16.mxu1 %v3279_v30  ;;  %v3480_v30 = vrot.slane %v70_v24, %v78_v26 }
 0x105   :  { %v3470_v25 = vpop.f32.mrb[0].mxu0 }
 0x106   :  { %v3472_v31 = vpop.f32.mrb[1].mxu0  ;;  %v3474_v33 = vpop.f32.mrb[0].mxu1 }
 0x107   :  { %v3476_v37 = vpop.f32.mrb[1].mxu1 }
 0x109   :  { %v189_v39 = vpop.f32.mrb[2].mxu0 }
 0x10a   :  { %v3485_v43 = vadd.f32 %v189_v39, %v3478_v29  ;;  %v191_v44 = vpop.f32.mrb[3].mxu0  ;;  %v302_v48 = vpop.f32.mrb[2].mxu1 }
 0x10b   :  { %v3492_v52 = vadd.f32 %v191_v44, %v3480_v30  ;;  %v3495_v55 = vadd.f32 %v302_v48, %v3482_v41  ;;  %v304_v56 = vpop.f32.mrb[3].mxu1 }
 0x10c   :  { %v3498_v59 = vadd.f32 %v304_v56, %v3487_v46  ;;  %v398_v56 = vand.u32 127, %v378_v15 }
 0x10d   :  { %4157 = vst [vmem:[#allocation12_spill] sm:$0xff] %v3492_v52  ;;  %4158 = vst [vmem:[#allocation13_spill] sm:$0xff] %v3495_v55  ;;  %v195_v61 = vpop.f32.mrb[4].mxu0 }
 0x10e   :  { %4159 = vst [vmem:[#allocation14_spill] sm:$0xff] %v3498_v59  ;;  %v196_v62 = vadd.f32 %v195_v61, %v3478_v29  ;;  %v197_v2 = vpop.f32.mrb[5].mxu0  ;;  %v308_v3 = vpop.f32.mrb[4].mxu1  ;;  %vm3535_vm3 = vcmp.lt.s32.totalorder %v398_v56, 64 }
 0x10f   :  { %v3503_v8 = vadd.f32 %v197_v2, %v3480_v30  ;;  %v3506_v11 = vadd.f32 %v308_v3, %v3482_v41  ;;  %v310_v12 = vpop.f32.mrb[5].mxu1  ;;  %v405_v2 = vand.u32 127, %v379_v21 }
 0x110   :  { %v3510_v19 = vadd.f32 %v310_v12, %v3487_v46 }
 0x111   :  { %4160 = vst [vmem:[#allocation15_spill] sm:$0xff] %v3503_v8  ;;  %v201_v22 = vpop.f32.mrb[6].mxu0  ;;  %vm3542_vm4 = vcmp.lt.s32.totalorder %v405_v2, 64 }
 0x112   :  { %4161 = vst [vmem:[#allocation16_spill] sm:$0xff] %v3510_v19  ;;  %v202_v24 = vadd.f32 %v201_v22, %v3478_v29  ;;  %v203_v26 = vpop.f32.mrb[7].mxu0  ;;  %v314_v28 = vpop.f32.mrb[6].mxu1 }
 0x113   :  { %v3515_v39 = vadd.f32 %v203_v26, %v3480_v30  ;;  %v3518_v44 = vadd.f32 %v314_v28, %v3482_v41  ;;  %v316_v48 = vpop.f32.mrb[7].mxu1 }
 0x114   :  { %v3521_v61 = vadd.f32 %v316_v48, %v3487_v46 }
 0x115   :  { %4162 = vst [vmem:[#allocation17_spill] sm:$0xff] %v3515_v39  ;;  %4163 = vst [vmem:[#allocation18_spill] sm:$0xff] %v3518_v44  ;;  %v207_v3 = vpop.f32.mrb[8].mxu0 }
 0x116   :  { %4164 = vst [vmem:[#allocation19_spill] sm:$0xff] %v3521_v61  ;;  %v208_v12 = vadd.f32 %v207_v3, %v3478_v29  ;;  %v209_v22 = vpop.f32.mrb[9].mxu0  ;;  %v320_v0 = vpop.f32.mrb[8].mxu1 }
 0x117   :  { %v3530_v26 = vadd.f32 %v209_v22, %v3480_v30  ;;  %v3533_v15 = vadd.f32 %v320_v0, %v3482_v41  ;;  %v322_v28 = vpop.f32.mrb[9].mxu1 }
 0x118   :  { %v3540_v48 = vadd.f32 %v322_v28, %v3487_v46  ;;  %v3548_v34 = vsel %vm428_vm1, %v202_v24, %v208_v12  ;;  %v3552_v0 = vsel %vm428_vm1, %v208_v12, %v202_v24 }
 0x119   :  { %4167 = vst [vmem:[#allocation20_spill] sm:$0xff] %v3530_v26  ;;  %4168 = vst [vmem:[#allocation21_spill] sm:$0xff] %v3533_v15  ;;  %v213_v22 = vpop.f32.mrb[10].mxu0 }
 0x11a   :  { %4171 = vst [vmem:[#allocation22_spill] sm:$0xff] %v3540_v48  ;;  %4174 = vst [vmem:[#allocation23_spill] sm:$0xff] %v3548_v34  ;;  %v214_v12 = vadd.f32 %v213_v22, %v3478_v29  ;;  %v326_v34 = vpop.f32.mrb[10].mxu1 }
 0x11b   :  { %4175 = vst [vmem:[#allocation24_spill] sm:$0xff] %v3552_v0  ;;  %v215_v0 = vpop.f32.mrb[11].mxu0  ;;  %v3583_v15 = vadd.f32 %v326_v34, %v3482_v41  ;;  %v328_v24 = vpop.f32.mrb[11].mxu1 }
 0x11c   :  { %v3580_v28 = vadd.f32 %v215_v0, %v3480_v30  ;;  %v3586_v22 = vadd.f32 %v328_v24, %v3487_v46  ;;  %v3590_v26 = vsel %vm428_vm1, %v196_v62, %v214_v12  ;;  %v3594_v56 = vsel %vm428_vm1, %v214_v12, %v196_v62 }
 0x11d   :  { %4177 = vst [vmem:[#allocation26_spill] sm:$0xff] %v3583_v15  ;;  %4179 = vst [vmem:[#allocation28_spill] sm:$0xff] %v3594_v56  ;;  %v219_v39 = vpop.f32.mrb[12].mxu0 }
 0x11e   :  { %4176 = vst [vmem:[#allocation25_spill] sm:$0xff] %v3580_v28  ;;  %4178 = vst [vmem:[#allocation27_spill] sm:$0xff] %v3586_v22  ;;  %v220_v12 = vadd.f32 %v219_v39, %v3478_v29  ;;  %v332_v2 = vpop.f32.mrb[12].mxu1  ;;  %v221_v56 = vpop.f32.mrb[13].mxu0  ;;  %v3683_v22 = vadd.f32 %v3476_v37, %v3487_v46 }
 0x11f   :  { %v3622_v24 = vadd.f32 %v332_v2, %v3482_v41  ;;  %v3625_v48 = vadd.f32 %v221_v56, %v3480_v30  ;;  %v334_v62 = vpop.f32.mrb[13].mxu1 }
 0x120   :  { %v3628_v39 = vadd.f32 %v334_v62, %v3487_v46  ;;  %v3633_v61 = vsel %vm428_vm1, %v3485_v43, %v220_v12  ;;  %v3638_v0 = vsel %vm428_vm1, %v220_v12, %v3485_v43  ;;  %v184_v12 = vadd.f32 %v3470_v25, %v3478_v29  ;;  %4188 = vst [vmem:[#allocation37_spill] sm:$0xff] %v3683_v22 }
 0x121   :  { %4180 = vst [vmem:[#allocation29_spill] sm:$0xff] %v3622_v24  ;;  %4181 = vst [vmem:[#allocation30_spill] sm:$0xff] %v3625_v48  ;;  %v225_v34 = vpop.f32.mrb[14].mxu0  ;;  %v3669_v43 = vadd.f32 %v3472_v31, %v3480_v30  ;;  %v3673_v25 = vadd.f32 %v3474_v33, %v3482_v41 }
 0x122   :  { %4182 = vst [vmem:[#allocation31_spill] sm:$0xff] %v3628_v39  ;;  %4183 = vst [vmem:[#allocation32_spill] sm:$0xff] %v3638_v0  ;;  %v226_v56 = vadd.f32 %v225_v34, %v3478_v29  ;;  %v338_v0 = vpop.f32.mrb[14].mxu1  ;;  %v227_v44 = vpop.f32.mrb[15].mxu0 }
 0x123   :  { %4184 = vst [vmem:[#allocation33_spill] sm:$0xff] %v3669_v43  ;;  %4185 = vst [vmem:[#allocation34_spill] sm:$0xff] %v3673_v25  ;;  %v3676_v29 = vadd.f32 %v338_v0, %v3482_v41  ;;  %v3679_v34 = vadd.f32 %v227_v44, %v3480_v30  ;;  %v340_v2 = vpop.f32.mrb[15].mxu1 }
 0x124   :  { %v3686_v62 = vadd.f32 %v340_v2, %v3487_v46  ;;  %v510_v31 = vsel %vm428_vm1, %v184_v12, %v226_v56  ;;  %v3692_v33 = vsel %vm428_vm1, %v226_v56, %v184_v12 }
 0x125   :  { %4186 = vst [vmem:[#allocation35_spill] sm:$0xff] %v3676_v29  ;;  %4187 = vst [vmem:[#allocation36_spill] sm:$0xff] %v3679_v34  ;;  %v580_v41 = vpop.f32.mrb[16].mxu0  ;;  %v512_v30 = vsel %vm3535_vm3, %v3673_v25, %v3676_v29  ;;  %v511_v37 = vsel %vm3525_vm2, %v3669_v43, %v3679_v34 }
 0x126   :  { %4189 = vst [vmem:[#allocation38_spill] sm:$0xff] %v3686_v62  ;;  %4190 = vst [vmem:[#allocation39_spill] sm:$0xff] %v3692_v33  ;;  %v581_v44 = vadd.f32 %v580_v41, %v510_v31  ;;  %v651_v0 = vpop.f32.mrb[16].mxu1  ;;  %v582_v56 = vpop.f32.mrb[17].mxu0  ;;  %v513_v2 = vsel %vm3542_vm4, %v3683_v22, %v3686_v62 }
 0x127   :  { %v652_v33 = vadd.f32 %v651_v0, %v512_v30  ;;  %v583_v46 = vadd.f32 %v582_v56, %v511_v37  ;;  %v653_v25 = vpop.f32.mrb[17].mxu1 }
 0x128   :  { %v2458_v29 = vmul.f32 -1.442695, %v581_v44  ;;  %v654_v19 = vadd.f32 %v653_v25, %v513_v2  ;;  %v1191_v2 = vld [vmem:[#allocation6 + $0x10] sm:$0xff] }
 0x129   :  { %v2459_v28 = vmul.f32 -1.442695, %v583_v46  ;;  %v2460_v31 = vmul.f32 -1.442695, %v652_v33  ;;  %v1189_v33 = vld [vmem:[#allocation6] sm:$0xff] }
 0x12a   :  { %3018 = vpow2.f32 %v2458_v29  ;;  %v1193_v46 = vld [vmem:[#allocation6 + $0x20] sm:$0xff] }
 0x12b   :  { %3020 = vpow2.f32 %v2459_v28  ;;  %v3783_v56 = vpack.c.bf16 %v1193_v46, %v1189_v33  ;;  %v1221_v33 = vld [vmem:[#allocation6 + $0x100] sm:$0xff] }
 0x12c   :  { %3022 = vpow2.f32 %v2460_v31  ;;  %v1225_v46 = vld [vmem:[#allocation6 + $0x120] sm:$0xff] }
 0x12d   :  { %3024 = vtanh.f32 %v654_v19 }
 0x134   :  { %v3019_v41 = vpop.eup %3018 }
 0x135   :  { %v665_v51 = vadd.f32 1.0, %v3019_v41  ;;  %v3021_v43 = vpop.eup %3020  ;;  %v1198_v41 = vld [vmem:[#allocation6 + $0x48] sm:$0xff] }
 0x136   :  { %v666_v34 = vadd.f32 1.0, %v3021_v43  ;;  %v3023_v8 = vpop.eup %3022 }
 0x137   :  { %3026 = vrcp.f32 %v665_v51  ;;  %v3025_v15 = vpop.eup %3024  ;;  %v667_v0 = vadd.f32 1.0, %v3023_v8  ;;  %v4191_v8 = vmov 0.0  }
 0x138   :  { %3028 = vrcp.f32 %v666_v34  ;;  %v1196_v34 = vld [vmem:[#allocation6 + $0x38] sm:$0xff] }
 0x139   :  { %3030 = vrcp.f32 %v667_v0 }
 0x141   :  { %v3027_v12 = vpop.eup %3026 }
 0x142   :  { %v676_v30 = vmul.f32 %v3027_v12, %v3025_v15  ;;  %v3029_v37 = vpop.eup %3028  ;;  %v1192_v15 = vld [vmem:[#allocation6 + $0x18] sm:$0xff]  ;;  %v1195_v12 = vld [vmem:[#allocation6 + $0x30] sm:$0xff] }
 0x143   :  { %v675_v44 = vmul.f32 0.0, %v3029_v37  ;;  %v3031_v28 = vpop.eup %3030  ;;  %v3781_v51 = vpack.c.bf16 %v1196_v34, %v1192_v15  ;;  %v3786_v31 = vpack.c.bf16 %v1195_v12, %v1191_v2  ;;  %v1200_v37 = vld [vmem:[#allocation6 + $0x58] sm:$0xff]  ;;  %v3831_v12 = vpack.c.bf16 %v1225_v46, %v1221_v33 }
 0x144   :  { %v1228_v34 = vld [vmem:[#allocation6 + $0x138] sm:$0xff] }
 0x145   :  { %v3718_v25 = vadd.f32 %v676_v30, %v675_v44  ;;  %v1202_v30 = vld [vmem:[#allocation6 + $0x68] sm:$0xff]  ;;  %v1204_v44 = vld [vmem:[#allocation6 + $0x78] sm:$0xff] }
 0x146   :  { %v3791_v0 = vpack.c.bf16 %v1202_v30, %v1198_v41  ;;  %v1223_v41 = vld [vmem:[#allocation6 + $0x110] sm:$0xff] }
 0x147   :  { %3032 = vtanh.f32 %v3718_v25  ;;  %v1227_v30 = vld [vmem:[#allocation6 + $0x130] sm:$0xff] }
 0x151   :  { %v3033_v29 = vpop.eup %3032 }
 0x152   :  { %v679_v19 = vmul.f32 %v3033_v29, %v3031_v28  ;;  %v1201_v28 = vld [vmem:[#allocation6 + $0x60] sm:$0xff]  ;;  %v3793_v29 = vpack.c.bf16 %v1204_v44, %v1200_v37  ;;  %v3834_v37 = vpack.c.bf16 %v1227_v30, %v1223_v41  ;;  %v1230_v44 = vld [vmem:[#allocation6 + $0x148] sm:$0xff]  ;;  %v1248_v41 = vld [vmem:[#allocation6 + $0x1d8] sm:$0xff] }
 0x153   :  { %v1252_v30 = vld [vmem:[#allocation6 + $0x1f8] sm:$0xff] }
 0x154   :  { %681 = vst.msk [vmem:[#allocation8] sm:$0xff] %vm680_vm5, %v679_v19  ;;  %832 = vmatmul.mubr.f32.vlgmr.msra.gmra.mrb[18].mxu0 %v679_v19  ;;  %903 = vmatmul.mubr.f32.vlgmr.msra.gmra.mrb[18].mxu1 %v679_v19 }
 0x155   :  { %684 = vst.msk [vmem:[#allocation8 + $0x38] sm:$0xff] %vm683_vm6, %v679_v19  ;;  %2629 = vmatpush1.bf16.msra.mxu0 %v3284_v35  ;;  %2661 = vmatpush1.bf16.msra.mxu1 %v3287_v38 }
 0x156   :  { %2631 = vmatprep.subr.bf16.mxu0 %v3290_v42  ;;  %2663 = vmatprep.subr.bf16.mxu1 %v3296_v47  ;;  %v4192_v47 = vsel %vm3535_vm3, %v3495_v55, %v3622_v24 }
 0x157   :  { %1083 = vmatprep.mubr.f32.mxu0 %v4191_v8  ;;  %1154 = vmatprep.mubr.f32.mxu1 %v4191_v8 }
 0x159   :  { %2633 = vmatpush1.bf16.msra.mxu0 %v3300_v50  ;;  %2665 = vmatpush1.bf16.msra.mxu1 %v3304_v54 }
 0x15a   :  { %2635 = vmatprep.subr.bf16.mxu0 %v3308_v57  ;;  %2667 = vmatprep.subr.bf16.mxu1 %v3312_v60  ;;  %v4193_v60 = vsel %vm3525_vm2, %v3492_v52, %v3625_v48 }
 0x15d   :  { %2637 = vmatpush1.bf16.msra.mxu0 %v3319_v1  ;;  %2669 = vmatpush1.bf16.msra.mxu1 %v3323_v4  ;;  %v4194_v4 = vsel %vm3542_vm4, %v3498_v59, %v3628_v39 }
 0x15e   :  { %2639 = vmatprep.subr.bf16.mxu0 %v3327_v7  ;;  %2671 = vmatprep.subr.bf16.mxu1 %v3331_v10 }
 0x161   :  { %2641 = vmatpush1.bf16.msra.mxu0 %v3338_v14  ;;  %2673 = vmatpush1.bf16.msra.mxu1 %v3342_v17 }
 0x162   :  { %2643 = vmatprep.subr.bf16.mxu0 %v3346_v20  ;;  %2675 = vmatprep.subr.bf16.mxu1 %v3350_v23 }
 0x165   :  { %2645 = vmatpush1.bf16.msra.mxu0 %v3357_v27  ;;  %2677 = vmatpush1.bf16.msra.mxu1 %v3361_v32 }
 0x166   :  { %2647 = vmatprep.subr.bf16.mxu0 %v3365_v36  ;;  %2679 = vmatprep.subr.bf16.mxu1 %v3369_v40 }
 0x169   :  { %2649 = vmatpush1.bf16.msra.mxu0 %v3376_v45  ;;  %2681 = vmatpush1.bf16.msra.mxu1 %v3380_v49 }
 0x16a   :  { %2651 = vmatprep.subr.bf16.mxu0 %v3384_v53  ;;  %2683 = vmatprep.subr.bf16.mxu1 %v3388_v58 }
 0x16d   :  { %2653 = vmatpush1.bf16.msra.mxu0 %v3395_v63  ;;  %2685 = vmatpush1.bf16.msra.mxu1 %v3399_v5 }
 0x16e   :  { %2655 = vmatprep.subr.bf16.mxu0 %v3403_v9  ;;  %2687 = vmatprep.subr.bf16.mxu1 %v3407_v13 }
 0x171   :  { %2657 = vmatpush1.bf16.msra.mxu0 %v3414_v16  ;;  %2689 = vmatpush1.bf16.msra.mxu1 %v3418_v18  ;;  %v1190_v18 = vld [vmem:[#allocation6 + $0x8] sm:$0xff] }
 0x172   :  { %2723 = vmatprep.subr.bf16.mxu1 %v3781_v51 }
 0x227   :  { %v833_v35 = vpop.f32.mrb[18].mxu0  ;;  %v904_v38 = vpop.f32.mrb[18].mxu1 }
 0x228   :  { %v834_v42 = vadd.f32 %v833_v35, %v3633_v61  ;;  %v905_v50 = vadd.f32 %v904_v38, %v4192_v47  ;;  %v835_v54 = vpop.f32.mrb[19].mxu0  ;;  %v906_v57 = vpop.f32.mrb[19].mxu1  ;;  %v1194_v61 = vld [vmem:[#allocation6 + $0x28] sm:$0xff]  ;;  %v1199_v35 = vld [vmem:[#allocation6 + $0x50] sm:$0xff] }
 0x229   :  { %v836_v1 = vadd.f32 %v835_v54, %v4193_v60  ;;  %v907_v7 = vadd.f32 %v906_v57, %v4194_v4  ;;  %v3779_v43 = vpack.c.bf16 %v1194_v61, %v1190_v18  ;;  %v1203_v38 = vld [vmem:[#allocation6 + $0x70] sm:$0xff]  ;;  %v1206_v47 = vld [vmem:[#allocation6 + $0x88] sm:$0xff]  ;;  %v1208_v54 = vld [vmem:[#allocation6 + $0x98] sm:$0xff] }
 0x22a   :  { %v2461_v10 = vmul.f32 -1.442695, %v834_v42  ;;  %v2463_v17 = vmul.f32 -1.442695, %v905_v50  ;;  %v3798_v42 = vpack.c.bf16 %v1203_v38, %v1199_v35  ;;  %v1210_v50 = vld [vmem:[#allocation6 + $0xa8] sm:$0xff]  ;;  %v1212_v60 = vld [vmem:[#allocation6 + $0xb8] sm:$0xff] }
 0x22b   :  { %v2462_v14 = vmul.f32 -1.442695, %v836_v1  ;;  %2691 = vmatprep.subr.bf16.mxu0 %v3779_v43  ;;  %v3803_v57 = vpack.c.bf16 %v1210_v50, %v1206_v47  ;;  %v1205_v1 = vld [vmem:[#allocation6 + $0x80] sm:$0xff]  ;;  %v1226_v18 = vld [vmem:[#allocation6 + $0x128] sm:$0xff]  ;;  %v1224_v61 = vld [vmem:[#allocation6 + $0x118] sm:$0xff] }
 0x22c   :  { %3034 = vpow2.f32 %v2461_v10  ;;  %v1209_v4 = vld [vmem:[#allocation6 + $0xa0] sm:$0xff]  ;;  %v3829_v2 = vpack.c.bf16 %v1228_v34, %v1224_v61  ;;  %v1236_v38 = vld [vmem:[#allocation6 + $0x178] sm:$0xff]  ;;  %v1246_v61 = vld [vmem:[#allocation6 + $0x1c8] sm:$0xff] }
 0x22d   :  { %3036 = vpow2.f32 %v2462_v14  ;;  %v3807_v10 = vpack.c.bf16 %v1209_v4, %v1205_v1  ;;  %v1207_v14 = vld [vmem:[#allocation6 + $0x90] sm:$0xff]  ;;  %v1229_v47 = vld [vmem:[#allocation6 + $0x140] sm:$0xff]  ;;  %v1250_v34 = vld [vmem:[#allocation6 + $0x1e8] sm:$0xff] }
 0x22e   :  { %3038 = vtanh.f32 %v907_v7  ;;  %v3805_v7 = vpack.c.bf16 %v1212_v60, %v1208_v54  ;;  %v1233_v50 = vld [vmem:[#allocation6 + $0x160] sm:$0xff]  ;;  %v1231_v1 = vld [vmem:[#allocation6 + $0x150] sm:$0xff]  ;;  %v3861_v46 = vpack.c.bf16 %v1250_v34, %v1246_v61  ;;  %v4198_v61 = vld [vmem:[#allocation25_spill] sm:$0xff] }
 0x22f   :  { %3040 = vpow2.f32 %v2463_v17  ;;  %v1211_v17 = vld [vmem:[#allocation6 + $0xb0] sm:$0xff]  ;;  %v3843_v60 = vpack.c.bf16 %v1233_v50, %v1229_v47 }
 0x230   :  { %v1235_v4 = vld [vmem:[#allocation6 + $0x170] sm:$0xff] }
 0x231   :  { %v1251_v47 = vld [vmem:[#allocation6 + $0x1f0] sm:$0xff] }
 0x236   :  { %v3035_v20 = vpop.eup %3034 }
 0x237   :  { %v918_v23 = vadd.f32 1.0, %v3035_v20  ;;  %v3037_v27 = vpop.eup %3036  ;;  %v3810_v20 = vpack.c.bf16 %v1211_v17, %v1207_v14  ;;  %v1238_v14 = vld [vmem:[#allocation6 + $0x188] sm:$0xff]  ;;  %v3846_v17 = vpack.c.bf16 %v1235_v4, %v1231_v1 }
 0x238   :  { %v919_v32 = vadd.f32 1.0, %v3037_v27  ;;  %v3039_v36 = vpop.eup %3038  ;;  %v1218_v27 = vld [vmem:[#allocation6 + $0xe8] sm:$0xff] }
 0x239   :  { %3042 = vrcp.f32 %v918_v23  ;;  %v3041_v40 = vpop.eup %3040  ;;  %v1214_v23 = vld [vmem:[#allocation6 + $0xc8] sm:$0xff] }
 0x23a   :  { %3044 = vrcp.f32 %v919_v32  ;;  %v920_v58 = vadd.f32 1.0, %v3041_v40  ;;  %v1216_v32 = vld [vmem:[#allocation6 + $0xd8] sm:$0xff] }
 0x23b   :  { %v1220_v40 = vld [vmem:[#allocation6 + $0xf8] sm:$0xff] }
 0x23c   :  { %3046 = vrcp.f32 %v920_v58 }
 0x243   :  { %v3043_v45 = vpop.eup %3042 }
 0x244   :  { %v929_v49 = vmul.f32 %v3043_v45, %v3039_v36  ;;  %v3045_v53 = vpop.eup %3044  ;;  %v3815_v36 = vpack.c.bf16 %v1218_v27, %v1214_v23  ;;  %v1213_v45 = vld [vmem:[#allocation6 + $0xc0] sm:$0xff]  ;;  %v1242_v23 = vld [vmem:[#allocation6 + $0x1a8] sm:$0xff]  ;;  %v1240_v27 = vld [vmem:[#allocation6 + $0x198] sm:$0xff] }
 0x245   :  { %v928_v63 = vmul.f32 %v3045_v53, %v3718_v25  ;;  %v1197_v25 = vld [vmem:[#allocation6 + $0x40] sm:$0xff]  ;;  %v3817_v53 = vpack.c.bf16 %v1220_v40, %v1216_v32  ;;  %v1244_v32 = vld [vmem:[#allocation6 + $0x1b8] sm:$0xff]  ;;  %v3850_v40 = vpack.c.bf16 %v1242_v23, %v1238_v14 }
 0x246   :  { %v3047_v9 = vpop.eup %3046  ;;  %v3795_v19 = vpack.c.bf16 %v1201_v28, %v1197_v25  ;;  %v1234_v25 = vld [vmem:[#allocation6 + $0x168] sm:$0xff]  ;;  %v1232_v28 = vld [vmem:[#allocation6 + $0x158] sm:$0xff] }
 0x247   :  { %v3772_v5 = vadd.f32 %v929_v49, %v928_v63  ;;  %v1217_v49 = vld [vmem:[#allocation6 + $0xe0] sm:$0xff]  ;;  %v1215_v63 = vld [vmem:[#allocation6 + $0xd0] sm:$0xff]  ;;  %v3839_v35 = vpack.c.bf16 %v1234_v25, %v1230_v44  ;;  %v3841_v54 = vpack.c.bf16 %v1236_v38, %v1232_v28  ;;  %v3863_v25 = vpack.c.bf16 %v1252_v30, %v1248_v41 }
 0x248   :  { %v3819_v58 = vpack.c.bf16 %v1217_v49, %v1213_v45  ;;  %v3852_v45 = vpack.c.bf16 %v1244_v32, %v1240_v27  ;;  %v1237_v49 = vld [vmem:[#allocation6 + $0x180] sm:$0xff]  ;;  %v1247_v38 = vld [vmem:[#allocation6 + $0x1d0] sm:$0xff] }
 0x249   :  { %3048 = vtanh.f32 %v3772_v5  ;;  %v1245_v44 = vld [vmem:[#allocation6 + $0x1c0] sm:$0xff]  ;;  %v3870_v1 = vpack.c.bf16 %v1251_v47, %v1247_v38  ;;  %v4195_v27 = vld [vmem:[#allocation26_spill] sm:$0xff] }
 0x24a   :  { %v1249_v28 = vld [vmem:[#allocation6 + $0x1e0] sm:$0xff]  ;;  %v4196_v32 = vsel %vm3535_vm3, %v3506_v11, %v4195_v27 }
 0x24b   :  { %v3866_v50 = vpack.c.bf16 %v1249_v28, %v1245_v44  ;;  %v4200_v30 = vld [vmem:[#allocation16_spill] sm:$0xff]  ;;  %v4201_v44 = vld [vmem:[#allocation27_spill] sm:$0xff] }
 0x24c   :  { %v4202_v28 = vsel %vm3542_vm4, %v4200_v30, %v4201_v44 }
 0x253   :  { %v3049_v13 = vpop.eup %3048 }
 0x254   :  { %v932_v16 = vmul.f32 %v3049_v13, %v3047_v9  ;;  %v1219_v9 = vld [vmem:[#allocation6 + $0xf0] sm:$0xff] }
 0x255   :  { %v3822_v13 = vpack.c.bf16 %v1219_v9, %v1215_v63  ;;  %v1241_v63 = vld [vmem:[#allocation6 + $0x1a0] sm:$0xff]  ;;  %v1239_v9 = vld [vmem:[#allocation6 + $0x190] sm:$0xff] }
 0x256   :  { %934 = vst.msk [vmem:[#allocation8 + $0x8] sm:$0xff] %vm680_vm5, %v932_v16  ;;  %1084 = vmatmul.mubr.f32.vlgmr.msra.gmra.mrb[20].mxu0 %v932_v16  ;;  %1155 = vmatmul.mubr.f32.vlgmr.msra.gmra.mrb[20].mxu1 %v932_v16 }
 0x257   :  { %936 = vst.msk [vmem:[#allocation8 + $0x30] sm:$0xff] %vm683_vm6, %v932_v16  ;;  %1335 = vmatprep.mubr.f32.mxu0 %v4191_v8  ;;  %1406 = vmatprep.mubr.f32.mxu1 %v4191_v8  ;;  %v1222_v16 = vld [vmem:[#allocation6 + $0x108] sm:$0xff] }
 0x258   :  { %2693 = vmatpush1.bf16.msra.mxu0 %v3783_v56  ;;  %2725 = vmatpush1.bf16.msra.mxu1 %v3786_v31  ;;  %v3827_v15 = vpack.c.bf16 %v1226_v18, %v1222_v16  ;;  %v3855_v16 = vpack.c.bf16 %v1241_v63, %v1237_v49  ;;  %v1243_v18 = vld [vmem:[#allocation6 + $0x1b0] sm:$0xff] }
 0x259   :  { %2695 = vmatprep.subr.bf16.mxu0 %v3791_v0  ;;  %2727 = vmatprep.subr.bf16.mxu1 %v3793_v29  ;;  %v3859_v33 = vpack.c.bf16 %v1243_v18, %v1239_v9  ;;  %v4197_v18 = vld [vmem:[#allocation15_spill] sm:$0xff] }
 0x25a   :  { %v4199_v34 = vsel %vm3525_vm2, %v4197_v18, %v4198_v61 }
 0x25c   :  { %2697 = vmatpush1.bf16.msra.mxu0 %v3795_v19  ;;  %2729 = vmatpush1.bf16.msra.mxu1 %v3798_v42 }
 0x25d   :  { %2699 = vmatprep.subr.bf16.mxu0 %v3803_v57  ;;  %2731 = vmatprep.subr.bf16.mxu1 %v3805_v7 }
 0x260   :  { %2701 = vmatpush1.bf16.msra.mxu0 %v3807_v10  ;;  %2733 = vmatpush1.bf16.msra.mxu1 %v3810_v20 }
 0x261   :  { %2703 = vmatprep.subr.bf16.mxu0 %v3815_v36  ;;  %2735 = vmatprep.subr.bf16.mxu1 %v3817_v53 }
 0x264   :  { %2705 = vmatpush1.bf16.msra.mxu0 %v3819_v58  ;;  %2737 = vmatpush1.bf16.msra.mxu1 %v3822_v13 }
 0x265   :  { %2707 = vmatprep.subr.bf16.mxu0 %v3827_v15  ;;  %2739 = vmatprep.subr.bf16.mxu1 %v3829_v2 }
 0x268   :  { %2709 = vmatpush1.bf16.msra.mxu0 %v3831_v12  ;;  %2741 = vmatpush1.bf16.msra.mxu1 %v3834_v37 }
 0x269   :  { %2711 = vmatprep.subr.bf16.mxu0 %v3839_v35  ;;  %2743 = vmatprep.subr.bf16.mxu1 %v3841_v54 }
 0x26c   :  { %2713 = vmatpush1.bf16.msra.mxu0 %v3843_v60  ;;  %2745 = vmatpush1.bf16.msra.mxu1 %v3846_v17 }
 0x26d   :  { %2715 = vmatprep.subr.bf16.mxu0 %v3850_v40  ;;  %2747 = vmatprep.subr.bf16.mxu1 %v3852_v45 }
 0x270   :  { %2717 = vmatpush1.bf16.msra.mxu0 %v3855_v16  ;;  %2749 = vmatpush1.bf16.msra.mxu1 %v3859_v33 }
 0x271   :  { %2719 = vmatprep.subr.bf16.mxu0 %v3861_v46  ;;  %2751 = vmatprep.subr.bf16.mxu1 %v3863_v25 }
 0x274   :  { %2721 = vmatpush1.bf16.msra.mxu0 %v3866_v50  ;;  %2753 = vmatpush1.bf16.msra.mxu1 %v3870_v1 }
 0x275   :  { %2755 = vmatprep.subr.bf16.mxu0 %v3779_v43  ;;  %2787 = vmatprep.subr.bf16.mxu1 %v3781_v51 }
 0x329   :  { %v1085_v4 = vpop.f32.mrb[20].mxu0  ;;  %v1156_v14 = vpop.f32.mrb[20].mxu1 }
 0x32a   :  { %v1086_v23 = vadd.f32 %v1085_v4, %v3590_v26  ;;  %v1157_v49 = vadd.f32 %v1156_v14, %v4196_v32  ;;  %v1087_v63 = vpop.f32.mrb[21].mxu0  ;;  %v1158_v9 = vpop.f32.mrb[21].mxu1 }
 0x32b   :  { %v1088_v41 = vadd.f32 %v1087_v63, %v4199_v34  ;;  %v1159_v26 = vadd.f32 %v1158_v9, %v4202_v28 }
 0x32c   :  { %v2464_v38 = vmul.f32 -1.442695, %v1086_v23  ;;  %v2466_v4 = vmul.f32 -1.442695, %v1157_v49 }
 0x32d   :  { %v2465_v47 = vmul.f32 -1.442695, %v1088_v41 }
 0x32e   :  { %3050 = vpow2.f32 %v2464_v38 }
 0x32f   :  { %3052 = vpow2.f32 %v2465_v47 }
 0x330   :  { %3054 = vtanh.f32 %v1159_v26 }
 0x331   :  { %3056 = vpow2.f32 %v2466_v4  ;;  %v4207_v4 = vld [vmem:[#allocation17_spill] sm:$0xff] }
 0x338   :  { %v3051_v14 = vpop.eup %3050 }
 0x339   :  { %v1170_v32 = vadd.f32 1.0, %v3051_v14  ;;  %v3053_v22 = vpop.eup %3052  ;;  %v4208_v14 = vld [vmem:[#allocation20_spill] sm:$0xff] }
 0x33a   :  { %v1171_v62 = vadd.f32 1.0, %v3053_v22  ;;  %v3055_v63 = vpop.eup %3054 }
 0x33b   :  { %3058 = vrcp.f32 %v1170_v32  ;;  %v3057_v34 = vpop.eup %3056  ;;  %v4209_v32 = vsel %vm3525_vm2, %v4207_v4, %v4208_v14 }
 0x33c   :  { %3060 = vrcp.f32 %v1171_v62  ;;  %v1172_v48 = vadd.f32 1.0, %v3057_v34  ;;  %v4205_v62 = vld [vmem:[#allocation21_spill] sm:$0xff]  ;;  %v4210_v34 = vld [vmem:[#allocation19_spill] sm:$0xff] }
 0x33e   :  { %3062 = vrcp.f32 %v1172_v48  ;;  %v4203_v48 = vld [vmem:[#allocation23_spill] sm:$0xff] }
 0x345   :  { %v3059_v59 = vpop.eup %3058 }
 0x346   :  { %v1181_v39 = vmul.f32 %v3059_v59, %v3055_v63  ;;  %v3061_v52 = vpop.eup %3060 }
 0x347   :  { %v1180_v23 = vmul.f32 %v3061_v52, %v3772_v5 }
 0x348   :  { %v3063_v49 = vpop.eup %3062 }
 0x349   :  { %v3894_v9 = vadd.f32 %v1181_v39, %v1180_v23  ;;  %v4204_v39 = vld [vmem:[#allocation18_spill] sm:$0xff] }
 0x34a   :  { %v4206_v5 = vsel %vm3535_vm3, %v4204_v39, %v4205_v62  ;;  %v4211_v23 = vld [vmem:[#allocation22_spill] sm:$0xff] }
 0x34b   :  { %3064 = vtanh.f32 %v3894_v9 }
 0x355   :  { %v3065_v41 = vpop.eup %3064 }
 0x356   :  { %v1184_v28 = vmul.f32 %v3065_v41, %v3063_v49  ;;  %v4212_v49 = vsel %vm3542_vm4, %v4210_v34, %v4211_v23 }
 0x358   :  { %1186 = vst.msk [vmem:[#allocation8 + $0x10] sm:$0xff] %vm680_vm5, %v1184_v28  ;;  %1336 = vmatmul.mubr.f32.vlgmr.msra.gmra.mrb[22].mxu0 %v1184_v28  ;;  %1407 = vmatmul.mubr.f32.vlgmr.msra.gmra.mrb[22].mxu1 %v1184_v28 }
 0x359   :  { %1188 = vst.msk [vmem:[#allocation8 + $0x28] sm:$0xff] %vm683_vm6, %v1184_v28  ;;  %2757 = vmatpush1.bf16.msra.mxu0 %v3783_v56  ;;  %2789 = vmatpush1.bf16.msra.mxu1 %v3786_v31 }
 0x35a   :  { %2759 = vmatprep.subr.bf16.mxu0 %v3791_v0  ;;  %2791 = vmatprep.subr.bf16.mxu1 %v3793_v29 }
 0x35b   :  { %1581 = vmatprep.mubr.f32.mxu0 %v4191_v8  ;;  %1652 = vmatprep.mubr.f32.mxu1 %v4191_v8 }
 0x35d   :  { %2761 = vmatpush1.bf16.msra.mxu0 %v3795_v19  ;;  %2793 = vmatpush1.bf16.msra.mxu1 %v3798_v42 }
 0x35e   :  { %2763 = vmatprep.subr.bf16.mxu0 %v3803_v57  ;;  %2795 = vmatprep.subr.bf16.mxu1 %v3805_v7 }
 0x361   :  { %2765 = vmatpush1.bf16.msra.mxu0 %v3807_v10  ;;  %2797 = vmatpush1.bf16.msra.mxu1 %v3810_v20 }
 0x362   :  { %2767 = vmatprep.subr.bf16.mxu0 %v3815_v36  ;;  %2799 = vmatprep.subr.bf16.mxu1 %v3817_v53 }
 0x365   :  { %2769 = vmatpush1.bf16.msra.mxu0 %v3819_v58  ;;  %2801 = vmatpush1.bf16.msra.mxu1 %v3822_v13 }
 0x366   :  { %2771 = vmatprep.subr.bf16.mxu0 %v3827_v15  ;;  %2803 = vmatprep.subr.bf16.mxu1 %v3829_v2 }
 0x369   :  { %2773 = vmatpush1.bf16.msra.mxu0 %v3831_v12  ;;  %2805 = vmatpush1.bf16.msra.mxu1 %v3834_v37 }
 0x36a   :  { %2775 = vmatprep.subr.bf16.mxu0 %v3839_v35  ;;  %2807 = vmatprep.subr.bf16.mxu1 %v3841_v54 }
 0x36d   :  { %2777 = vmatpush1.bf16.msra.mxu0 %v3843_v60  ;;  %2809 = vmatpush1.bf16.msra.mxu1 %v3846_v17 }
 0x36e   :  { %2779 = vmatprep.subr.bf16.mxu0 %v3850_v40  ;;  %2811 = vmatprep.subr.bf16.mxu1 %v3852_v45 }
 0x371   :  { %2781 = vmatpush1.bf16.msra.mxu0 %v3855_v16  ;;  %2813 = vmatpush1.bf16.msra.mxu1 %v3859_v33 }
 0x372   :  { %2783 = vmatprep.subr.bf16.mxu0 %v3861_v46  ;;  %2815 = vmatprep.subr.bf16.mxu1 %v3863_v25 }
 0x375   :  { %2785 = vmatpush1.bf16.msra.mxu0 %v3866_v50  ;;  %2817 = vmatpush1.bf16.msra.mxu1 %v3870_v1 }
 0x376   :  { %2819 = vmatprep.subr.bf16.mxu0 %v3779_v43  ;;  %2851 = vmatprep.subr.bf16.mxu1 %v3781_v51 }
 0x42b   :  { %v1337_v52 = vpop.f32.mrb[22].mxu0  ;;  %v1408_v59 = vpop.f32.mrb[22].mxu1 }
 0x42c   :  { %v1338_v22 = vadd.f32 %v1337_v52, %v4203_v48  ;;  %v1409_v26 = vadd.f32 %v1408_v59, %v4206_v5  ;;  %v1339_v38 = vpop.f32.mrb[23].mxu0  ;;  %v1410_v47 = vpop.f32.mrb[23].mxu1 }
 0x42d   :  { %v1340_v63 = vadd.f32 %v1339_v38, %v4209_v32  ;;  %v1411_v41 = vadd.f32 %v1410_v47, %v4212_v49 }
 0x42e   :  { %v2467_v28 = vmul.f32 -1.442695, %v1338_v22  ;;  %v2469_v48 = vmul.f32 -1.442695, %v1409_v26 }
 0x42f   :  { %v2468_v52 = vmul.f32 -1.442695, %v1340_v63 }
 0x430   :  { %3066 = vpow2.f32 %v2467_v28  ;;  %v4215_v28 = vsel %vm3525_vm2, %v4208_v14, %v4207_v4 }
 0x431   :  { %3068 = vpow2.f32 %v2468_v52 }
 0x432   :  { %3070 = vtanh.f32 %v1411_v41 }
 0x433   :  { %3072 = vpow2.f32 %v2469_v48 }
 0x43a   :  { %v3067_v59 = vpop.eup %3066 }
 0x43b   :  { %v1422_v5 = vadd.f32 1.0, %v3067_v59  ;;  %v3069_v55 = vpop.eup %3068 }
 0x43c   :  { %v1423_v24 = vadd.f32 1.0, %v3069_v55  ;;  %v3071_v38 = vpop.eup %3070 }
 0x43d   :  { %3074 = vrcp.f32 %v1422_v5  ;;  %v3073_v32 = vpop.eup %3072 }
 0x43e   :  { %3076 = vrcp.f32 %v1423_v24  ;;  %v1424_v61 = vadd.f32 1.0, %v3073_v32 }
 0x440   :  { %3078 = vrcp.f32 %v1424_v61 }
 0x447   :  { %v3075_v30 = vpop.eup %3074 }
 0x448   :  { %v1433_v44 = vmul.f32 %v3075_v30, %v3071_v38  ;;  %v3077_v18 = vpop.eup %3076  ;;  %v4214_v30 = vsel %vm3535_vm3, %v4205_v62, %v4204_v39 }
 0x449   :  { %v1432_v22 = vmul.f32 %v3077_v18, %v3894_v9  ;;  %v4213_v18 = vld [vmem:[#allocation24_spill] sm:$0xff] }
 0x44a   :  { %v3079_v26 = vpop.eup %3078 }
 0x44b   :  { %v3950_v47 = vadd.f32 %v1433_v44, %v1432_v22 }
 0x44d   :  { %3080 = vtanh.f32 %v3950_v47 }
 0x457   :  { %v3081_v63 = vpop.eup %3080 }
 0x458   :  { %v1436_v49 = vmul.f32 %v3081_v63, %v3079_v26 }
 0x45a   :  { %1438 = vst.msk [vmem:[#allocation8 + $0x18] sm:$0xff] %vm680_vm5, %v1436_v49  ;;  %1582 = vmatmul.mubr.f32.vlgmr.msra.gmra.mrb[24].mxu0 %v1436_v49  ;;  %1653 = vmatmul.mubr.f32.vlgmr.msra.gmra.mrb[24].mxu1 %v1436_v49 }
 0x45b   :  { %1440 = vst.msk [vmem:[#allocation8 + $0x20] sm:$0xff] %vm683_vm6, %v1436_v49  ;;  %2821 = vmatpush1.bf16.msra.mxu0 %v3783_v56  ;;  %2853 = vmatpush1.bf16.msra.mxu1 %v3786_v31 }
 0x45c   :  { %2823 = vmatprep.subr.bf16.mxu0 %v3791_v0  ;;  %2855 = vmatprep.subr.bf16.mxu1 %v3793_v29 }
 0x45d   :  { %1825 = vmatprep.mubr.f32.mxu0 %v4191_v8  ;;  %1896 = vmatprep.mubr.f32.mxu1 %v4191_v8 }
 0x45f   :  { %2825 = vmatpush1.bf16.msra.mxu0 %v3795_v19  ;;  %2857 = vmatpush1.bf16.msra.mxu1 %v3798_v42 }
 0x460   :  { %2827 = vmatprep.subr.bf16.mxu0 %v3803_v57  ;;  %2859 = vmatprep.subr.bf16.mxu1 %v3805_v7 }
 0x463   :  { %2829 = vmatpush1.bf16.msra.mxu0 %v3807_v10  ;;  %2861 = vmatpush1.bf16.msra.mxu1 %v3810_v20 }
 0x464   :  { %2831 = vmatprep.subr.bf16.mxu0 %v3815_v36  ;;  %2863 = vmatprep.subr.bf16.mxu1 %v3817_v53 }
 0x467   :  { %2833 = vmatpush1.bf16.msra.mxu0 %v3819_v58  ;;  %2865 = vmatpush1.bf16.msra.mxu1 %v3822_v13 }
 0x468   :  { %2835 = vmatprep.subr.bf16.mxu0 %v3827_v15  ;;  %2867 = vmatprep.subr.bf16.mxu1 %v3829_v2 }
 0x46b   :  { %2837 = vmatpush1.bf16.msra.mxu0 %v3831_v12  ;;  %2869 = vmatpush1.bf16.msra.mxu1 %v3834_v37 }
 0x46c   :  { %2839 = vmatprep.subr.bf16.mxu0 %v3839_v35  ;;  %2871 = vmatprep.subr.bf16.mxu1 %v3841_v54 }
 0x46f   :  { %2841 = vmatpush1.bf16.msra.mxu0 %v3843_v60  ;;  %2873 = vmatpush1.bf16.msra.mxu1 %v3846_v17 }
 0x470   :  { %2843 = vmatprep.subr.bf16.mxu0 %v3850_v40  ;;  %2875 = vmatprep.subr.bf16.mxu1 %v3852_v45 }
 0x473   :  { %2845 = vmatpush1.bf16.msra.mxu0 %v3855_v16  ;;  %2877 = vmatpush1.bf16.msra.mxu1 %v3859_v33 }
 0x474   :  { %2847 = vmatprep.subr.bf16.mxu0 %v3861_v46  ;;  %2879 = vmatprep.subr.bf16.mxu1 %v3863_v25 }
 0x477   :  { %2849 = vmatpush1.bf16.msra.mxu0 %v3866_v50  ;;  %2881 = vmatpush1.bf16.msra.mxu1 %v3870_v1 }
 0x478   :  { %2883 = vmatprep.subr.bf16.mxu0 %v3779_v43  ;;  %2915 = vmatprep.subr.bf16.mxu1 %v3781_v51  ;;  %v4216_v51 = vsel %vm3542_vm4, %v4211_v23, %v4210_v34 }
 0x52d   :  { %v1583_v55 = vpop.f32.mrb[24].mxu0  ;;  %v1654_v24 = vpop.f32.mrb[24].mxu1 }
 0x52e   :  { %v1584_v61 = vadd.f32 %v1583_v55, %v4213_v18  ;;  %v1655_v44 = vadd.f32 %v1654_v24, %v4214_v30  ;;  %v1585_v9 = vpop.f32.mrb[25].mxu0  ;;  %v1656_v41 = vpop.f32.mrb[25].mxu1  ;;  %v2174_v30 = vld [vmem:[#allocation6 + $0x8] sm:$0xff] }
 0x52f   :  { %v1586_v43 = vadd.f32 %v1585_v9, %v4215_v28  ;;  %v1657_v52 = vadd.f32 %v1656_v41, %v4216_v51  ;;  %v2176_v9 = vld [vmem:[#allocation6 + $0x18] sm:$0xff]  ;;  %v2177_v51 = vld [vmem:[#allocation6 + $0x20] sm:$0xff] }
 0x530   :  { %v2470_v48 = vmul.f32 -1.442695, %v1584_v61  ;;  %v2472_v39 = vmul.f32 -1.442695, %v1655_v44  ;;  %v2178_v44 = vld [vmem:[#allocation6 + $0x28] sm:$0xff]  ;;  %v2180_v28 = vld [vmem:[#allocation6 + $0x38] sm:$0xff] }
 0x531   :  { %v2471_v59 = vmul.f32 -1.442695, %v1586_v43  ;;  %v2946_v41 = vpack.c.bf16 %v2178_v44, %v2174_v30  ;;  %v2173_v43 = vld [vmem:[#allocation6] sm:$0xff]  ;;  %v2214_v30 = vld [vmem:[#allocation6 + $0x148] sm:$0xff] }
 0x532   :  { %3082 = vpow2.f32 %v2470_v48  ;;  %v2948_v48 = vpack.c.bf16 %v2177_v51, %v2173_v43  ;;  %v2218_v44 = vld [vmem:[#allocation6 + $0x168] sm:$0xff]  ;;  %v2213_v43 = vld [vmem:[#allocation6 + $0x140] sm:$0xff] }
 0x533   :  { %3084 = vpow2.f32 %v2471_v59  ;;  %v2175_v59 = vld [vmem:[#allocation6 + $0x10] sm:$0xff]  ;;  %v2217_v51 = vld [vmem:[#allocation6 + $0x160] sm:$0xff] }
 0x534   :  { %3086 = vtanh.f32 %v1657_v52  ;;  %v2978_v52 = vpack.c.bf16 %v2180_v28, %v2176_v9  ;;  %v2216_v9 = vld [vmem:[#allocation6 + $0x158] sm:$0xff] }
 0x535   :  { %3088 = vpow2.f32 %v2472_v39  ;;  %v2179_v39 = vld [vmem:[#allocation6 + $0x30] sm:$0xff]  ;;  %v2220_v28 = vld [vmem:[#allocation6 + $0x178] sm:$0xff] }
 0x53c   :  { %v3083_v62 = vpop.eup %3082 }
 0x53d   :  { %v1668_v5 = vadd.f32 1.0, %v3083_v62  ;;  %v3085_v38 = vpop.eup %3084  ;;  %v2980_v62 = vpack.c.bf16 %v2179_v39, %v2175_v59  ;;  %v2215_v59 = vld [vmem:[#allocation6 + $0x150] sm:$0xff] }
 0x53e   :  { %v1669_v32 = vadd.f32 1.0, %v3085_v38  ;;  %v3087_v4 = vpop.eup %3086  ;;  %v2186_v38 = vld [vmem:[#allocation6 + $0x68] sm:$0xff]  ;;  %v2219_v39 = vld [vmem:[#allocation6 + $0x170] sm:$0xff] }
 0x53f   :  { %3090 = vrcp.f32 %v1668_v5  ;;  %v3089_v14 = vpop.eup %3088  ;;  %v2182_v5 = vld [vmem:[#allocation6 + $0x48] sm:$0xff] }
 0x540   :  { %3092 = vrcp.f32 %v1669_v32  ;;  %v1670_v34 = vadd.f32 1.0, %v3089_v14  ;;  %v2184_v32 = vld [vmem:[#allocation6 + $0x58] sm:$0xff]  ;;  %v2181_v14 = vld [vmem:[#allocation6 + $0x40] sm:$0xff] }
 0x542   :  { %3094 = vrcp.f32 %v1670_v34  ;;  %v2183_v34 = vld [vmem:[#allocation6 + $0x50] sm:$0xff] }
 0x549   :  { %v3091_v22 = vpop.eup %3090 }
 0x54a   :  { %v1679_v26 = vmul.f32 %v3091_v22, %v3087_v4  ;;  %v3093_v63 = vpop.eup %3092  ;;  %v2188_v4 = vld [vmem:[#allocation6 + $0x78] sm:$0xff]  ;;  %v2185_v22 = vld [vmem:[#allocation6 + $0x60] sm:$0xff] }
 0x54b   :  { %v1678_v23 = vmul.f32 %v3093_v63, %v3950_v47  ;;  %v2952_v63 = vpack.c.bf16 %v2185_v22, %v2181_v14  ;;  %v2221_v22 = vld [vmem:[#allocation6 + $0x180] sm:$0xff] }
 0x54c   :  { %v3095_v55 = vpop.eup %3094 }
 0x54d   :  { %v4006_v49 = vadd.f32 %v1679_v26, %v1678_v23  ;;  %v2982_v26 = vpack.c.bf16 %v2188_v4, %v2184_v32  ;;  %v2187_v23 = vld [vmem:[#allocation6 + $0x70] sm:$0xff]  ;;  %v2224_v32 = vld [vmem:[#allocation6 + $0x198] sm:$0xff] }
 0x54f   :  { %3096 = vtanh.f32 %v4006_v49 }
 0x559   :  { %v3097_v24 = vpop.eup %3096 }
 0x55a   :  { %v1682_v18 = vmul.f32 %v3097_v24, %v3095_v55  ;;  %v2190_v55 = vld [vmem:[#allocation6 + $0x88] sm:$0xff] }
 0x55b   :  { %v2194_v24 = vld [vmem:[#allocation6 + $0xa8] sm:$0xff] }
 0x55c   :  { %1683 = vst.msk [vmem:[#allocation8 + $0x20] sm:$0xff] %vm680_vm5, %v1682_v18  ;;  %1826 = vmatmul.mubr.f32.vlgmr.msra.gmra.mrb[26].mxu0 %v1682_v18  ;;  %1897 = vmatmul.mubr.f32.vlgmr.msra.gmra.mrb[26].mxu1 %v1682_v18 }
 0x55d   :  { %1684 = vst.msk [vmem:[#allocation8 + $0x18] sm:$0xff] %vm683_vm6, %v1682_v18  ;;  %2885 = vmatpush1.bf16.msra.mxu0 %v3783_v56  ;;  %2917 = vmatpush1.bf16.msra.mxu1 %v3786_v31  ;;  %v2192_v18 = vld [vmem:[#allocation6 + $0x98] sm:$0xff] }
 0x55e   :  { %2887 = vmatprep.subr.bf16.mxu0 %v3791_v0  ;;  %2919 = vmatprep.subr.bf16.mxu1 %v3793_v29  ;;  %v4217_v0 = vld [vmem:[#allocation28_spill] sm:$0xff] }
 0x55f   :  { %2069 = vmatprep.mubr.f32.mxu0 %v4191_v8  ;;  %2140 = vmatprep.mubr.f32.mxu1 %v4191_v8 }
 0x561   :  { %2889 = vmatpush1.bf16.msra.mxu0 %v3795_v19  ;;  %2921 = vmatpush1.bf16.msra.mxu1 %v3798_v42  ;;  %v4218_v19 = vsel %vm3535_vm3, %v4195_v27, %v3506_v11 }
 0x562   :  { %2891 = vmatprep.subr.bf16.mxu0 %v3803_v57  ;;  %2923 = vmatprep.subr.bf16.mxu1 %v3805_v7 }
 0x565   :  { %2893 = vmatpush1.bf16.msra.mxu0 %v3807_v10  ;;  %2925 = vmatpush1.bf16.msra.mxu1 %v3810_v20  ;;  %v4219_v10 = vld [vmem:[#allocation25_spill] sm:$0xff]  ;;  %v4220_v20 = vld [vmem:[#allocation15_spill] sm:$0xff] }
 0x566   :  { %2895 = vmatprep.subr.bf16.mxu0 %v3815_v36  ;;  %2927 = vmatprep.subr.bf16.mxu1 %v3817_v53  ;;  %v4221_v36 = vsel %vm3525_vm2, %v4219_v10, %v4220_v20  ;;  %v2198_v20 = vld [vmem:[#allocation6 + $0xc8] sm:$0xff] }
 0x569   :  { %2897 = vmatpush1.bf16.msra.mxu0 %v3819_v58  ;;  %2929 = vmatpush1.bf16.msra.mxu1 %v3822_v13  ;;  %v4222_v58 = vld [vmem:[#allocation27_spill] sm:$0xff]  ;;  %v4223_v13 = vld [vmem:[#allocation16_spill] sm:$0xff] }
 0x56a   :  { %2899 = vmatprep.subr.bf16.mxu0 %v3827_v15  ;;  %2931 = vmatprep.subr.bf16.mxu1 %v3829_v2  ;;  %v4224_v15 = vsel %vm3542_vm4, %v4222_v58, %v4223_v13  ;;  %v2204_v13 = vld [vmem:[#allocation6 + $0xf8] sm:$0xff] }
 0x56d   :  { %2901 = vmatpush1.bf16.msra.mxu0 %v3831_v12  ;;  %2933 = vmatpush1.bf16.msra.mxu1 %v3834_v37 }
 0x56e   :  { %2903 = vmatprep.subr.bf16.mxu0 %v3839_v35  ;;  %2935 = vmatprep.subr.bf16.mxu1 %v3841_v54 }
 0x571   :  { %2905 = vmatpush1.bf16.msra.mxu0 %v3843_v60  ;;  %2937 = vmatpush1.bf16.msra.mxu1 %v3846_v17 }
 0x572   :  { %2907 = vmatprep.subr.bf16.mxu0 %v3850_v40  ;;  %2939 = vmatprep.subr.bf16.mxu1 %v3852_v45 }
 0x575   :  { %2909 = vmatpush1.bf16.msra.mxu0 %v3855_v16  ;;  %2941 = vmatpush1.bf16.msra.mxu1 %v3859_v33 }
 0x576   :  { %2911 = vmatprep.subr.bf16.mxu0 %v3861_v46  ;;  %2943 = vmatprep.subr.bf16.mxu1 %v3863_v25 }
 0x579   :  { %2913 = vmatpush1.bf16.msra.mxu0 %v3866_v50  ;;  %2945 = vmatpush1.bf16.msra.mxu1 %v3870_v1 }
 0x57a   :  { %2947 = vmatprep.subr.bf16.mxu0 %v2946_v41  ;;  %2979 = vmatprep.subr.bf16.mxu1 %v2978_v52  ;;  %v2966_v41 = vpack.c.bf16 %v2218_v44, %v2214_v30  ;;  %v2998_v52 = vpack.c.bf16 %v2220_v28, %v2216_v9 }
 0x62f   :  { %v1827_v56 = vpop.f32.mrb[26].mxu0  ;;  %v1898_v31 = vpop.f32.mrb[26].mxu1 }
 0x630   :  { %v1828_v29 = vadd.f32 %v1827_v56, %v4217_v0  ;;  %v1899_v42 = vadd.f32 %v1898_v31, %v4218_v19  ;;  %v1829_v57 = vpop.f32.mrb[27].mxu0  ;;  %v1900_v7 = vpop.f32.mrb[27].mxu1  ;;  %v2954_v56 = vpack.c.bf16 %v2194_v24, %v2190_v55  ;;  %v2196_v31 = vld [vmem:[#allocation6 + $0xb8] sm:$0xff]  ;;  %v2189_v0 = vld [vmem:[#allocation6 + $0x80] sm:$0xff]  ;;  %v2234_v55 = vld [vmem:[#allocation6 + $0x1e8] sm:$0xff] }
 0x631   :  { %v1830_v53 = vadd.f32 %v1829_v57, %v4221_v36  ;;  %v1901_v2 = vadd.f32 %v1900_v7, %v4224_v15  ;;  %v2986_v19 = vpack.c.bf16 %v2196_v31, %v2192_v18  ;;  %v2191_v57 = vld [vmem:[#allocation6 + $0x90] sm:$0xff]  ;;  %v2202_v36 = vld [vmem:[#allocation6 + $0xe8] sm:$0xff]  ;;  %v2197_v15 = vld [vmem:[#allocation6 + $0xc0] sm:$0xff] }
 0x632   :  { %v2473_v12 = vmul.f32 -1.442695, %v1828_v29  ;;  %v2475_v11 = vmul.f32 -1.442695, %v1899_v42  ;;  %v2193_v29 = vld [vmem:[#allocation6 + $0xa0] sm:$0xff]  ;;  %v2195_v7 = vld [vmem:[#allocation6 + $0xb0] sm:$0xff]  ;;  %v2958_v58 = vpack.c.bf16 %v2202_v36, %v2198_v20 }
 0x633   :  { %v2474_v37 = vmul.f32 -1.442695, %v1830_v53  ;;  %v2956_v42 = vpack.c.bf16 %v2193_v29, %v2189_v0  ;;  %v2988_v10 = vpack.c.bf16 %v2195_v7, %v2191_v57  ;;  %v2200_v53 = vld [vmem:[#allocation6 + $0xd8] sm:$0xff]  ;;  %v2229_v0 = vld [vmem:[#allocation6 + $0x1c0] sm:$0xff]  ;;  %v2235_v57 = vld [vmem:[#allocation6 + $0x1f0] sm:$0xff] }
 0x634   :  { %3098 = vpow2.f32 %v2473_v12  ;;  %v2990_v12 = vpack.c.bf16 %v2204_v13, %v2200_v53  ;;  %v2236_v31 = vld [vmem:[#allocation6 + $0x1f8] sm:$0xff]  ;;  %v4225_v53 = vld [vmem:[#allocation32_spill] sm:$0xff]  ;;  %v4226_v13 = vld [vmem:[#allocation29_spill] sm:$0xff] }
 0x635   :  { %3100 = vpow2.f32 %v2474_v37 }
 0x636   :  { %3102 = vtanh.f32 %v1901_v2  ;;  %v2201_v2 = vld [vmem:[#allocation6 + $0xe0] sm:$0xff] }
 0x637   :  { %3104 = vpow2.f32 %v2475_v11  ;;  %v2960_v37 = vpack.c.bf16 %v2201_v2, %v2197_v15  ;;  %v2199_v11 = vld [vmem:[#allocation6 + $0xd0] sm:$0xff]  ;;  %v4227_v15 = vld [vmem:[#allocation13_spill] sm:$0xff] }
 0x638   :  { %v4228_v2 = vsel %vm3535_vm3, %v4226_v13, %v4227_v15 }
 0x63e   :  { %v3099_v35 = vpop.eup %3098 }
 0x63f   :  { %v1912_v54 = vadd.f32 1.0, %v3099_v35  ;;  %v3101_v60 = vpop.eup %3100  ;;  %v2203_v35 = vld [vmem:[#allocation6 + $0xf0] sm:$0xff] }
 0x640   :  { %v1913_v17 = vadd.f32 1.0, %v3101_v60  ;;  %v3103_v40 = vpop.eup %3102  ;;  %v2206_v60 = vld [vmem:[#allocation6 + $0x108] sm:$0xff] }
 0x641   :  { %3106 = vrcp.f32 %v1912_v54  ;;  %v3105_v45 = vpop.eup %3104  ;;  %v2992_v54 = vpack.c.bf16 %v2203_v35, %v2199_v11  ;;  %v4229_v35 = vld [vmem:[#allocation30_spill] sm:$0xff] }
 0x642   :  { %3108 = vrcp.f32 %v1913_v17  ;;  %v1914_v25 = vadd.f32 1.0, %v3105_v45  ;;  %v2210_v17 = vld [vmem:[#allocation6 + $0x128] sm:$0xff] }
 0x643   :  { %v2962_v45 = vpack.c.bf16 %v2210_v17, %v2206_v60 }
 0x644   :  { %3110 = vrcp.f32 %v1914_v25 }
 0x64b   :  { %v3107_v16 = vpop.eup %3106 }
 0x64c   :  { %v1923_v33 = vmul.f32 %v3107_v16, %v3103_v40  ;;  %v3109_v46 = vpop.eup %3108  ;;  %v2208_v40 = vld [vmem:[#allocation6 + $0x118] sm:$0xff] }
 0x64d   :  { %v1922_v50 = vmul.f32 %v3109_v46, %v4006_v49  ;;  %v2984_v49 = vpack.c.bf16 %v2187_v23, %v2183_v34  ;;  %v2212_v16 = vld [vmem:[#allocation6 + $0x138] sm:$0xff]  ;;  %v2209_v46 = vld [vmem:[#allocation6 + $0x120] sm:$0xff]  ;;  %v2227_v23 = vld [vmem:[#allocation6 + $0x1b0] sm:$0xff] }
 0x64e   :  { %v3111_v27 = vpop.eup %3110  ;;  %v2994_v25 = vpack.c.bf16 %v2212_v16, %v2208_v40  ;;  %v4232_v40 = vld [vmem:[#allocation31_spill] sm:$0xff] }
 0x64f   :  { %v4060_v1 = vadd.f32 %v1923_v33, %v1922_v50  ;;  %v2205_v33 = vld [vmem:[#allocation6 + $0x100] sm:$0xff] }
 0x650   :  { %v2964_v50 = vpack.c.bf16 %v2209_v46, %v2205_v33 }
 0x651   :  { %3112 = vtanh.f32 %v4060_v1 }
 0x65b   :  { %v3113_v47 = vpop.eup %3112 }
 0x65c   :  { %v1926_v61 = vmul.f32 %v3113_v47, %v3111_v27  ;;  %v2207_v27 = vld [vmem:[#allocation6 + $0x110] sm:$0xff] }
 0x65d   :  { %v2211_v47 = vld [vmem:[#allocation6 + $0x130] sm:$0xff] }
 0x65e   :  { %1927 = vst.msk [vmem:[#allocation8 + $0x28] sm:$0xff] %vm680_vm5, %v1926_v61  ;;  %2070 = vmatmul.mubr.f32.vlgmr.msra.gmra.mrb[28].mxu0 %v1926_v61  ;;  %2141 = vmatmul.mubr.f32.vlgmr.msra.gmra.mrb[28].mxu1 %v1926_v61 }
 0x65f   :  { %1928 = vst.msk [vmem:[#allocation8 + $0x10] sm:$0xff] %vm683_vm6, %v1926_v61  ;;  %2313 = vmatprep.mubr.f32.mxu0 %v4191_v8  ;;  %2384 = vmatprep.mubr.f32.mxu1 %v4191_v8  ;;  %v2950_v8 = vpack.c.bf16 %v2186_v38, %v2182_v5  ;;  %v2996_v61 = vpack.c.bf16 %v2211_v47, %v2207_v27  ;;  %v2226_v38 = vld [vmem:[#allocation6 + $0x1a8] sm:$0xff] }
 0x660   :  { %2949 = vmatpush1.bf16.msra.mxu0 %v2948_v48  ;;  %2981 = vmatpush1.bf16.msra.mxu1 %v2980_v62  ;;  %v2968_v48 = vpack.c.bf16 %v2217_v51, %v2213_v43  ;;  %v2222_v62 = vld [vmem:[#allocation6 + $0x188] sm:$0xff]  ;;  %v3000_v5 = vpack.c.bf16 %v2219_v39, %v2215_v59 }
 0x661   :  { %2951 = vmatprep.subr.bf16.mxu0 %v2950_v8  ;;  %2983 = vmatprep.subr.bf16.mxu1 %v2982_v26  ;;  %v2228_v8 = vld [vmem:[#allocation6 + $0x1b8] sm:$0xff]  ;;  %v2970_v4 = vpack.c.bf16 %v2226_v38, %v2222_v62  ;;  %v2225_v26 = vld [vmem:[#allocation6 + $0x1a0] sm:$0xff] }
 0x662   :  { %v3002_v14 = vpack.c.bf16 %v2228_v8, %v2224_v32  ;;  %v2972_v34 = vpack.c.bf16 %v2225_v26, %v2221_v22  ;;  %v4235_v32 = vld [vmem:[#allocation39_spill] sm:$0xff] }
 0x664   :  { %2953 = vmatpush1.bf16.msra.mxu0 %v2952_v63  ;;  %2985 = vmatpush1.bf16.msra.mxu1 %v2984_v49  ;;  %v2223_v63 = vld [vmem:[#allocation6 + $0x190] sm:$0xff]  ;;  %v2230_v49 = vld [vmem:[#allocation6 + $0x1c8] sm:$0xff] }
 0x665   :  { %2955 = vmatprep.subr.bf16.mxu0 %v2954_v56  ;;  %2987 = vmatprep.subr.bf16.mxu1 %v2986_v19  ;;  %v3004_v24 = vpack.c.bf16 %v2227_v23, %v2223_v63  ;;  %v2974_v18 = vpack.c.bf16 %v2234_v55, %v2230_v49  ;;  %v2232_v56 = vld [vmem:[#allocation6 + $0x1d8] sm:$0xff]  ;;  %v2233_v19 = vld [vmem:[#allocation6 + $0x1e0] sm:$0xff]  ;;  %v4240_v23 = vld [vmem:[#allocation33_spill] sm:$0xff] }
 0x666   :  { %v3006_v29 = vpack.c.bf16 %v2236_v31, %v2232_v56  ;;  %v2976_v7 = vpack.c.bf16 %v2233_v19, %v2229_v0 }
 0x668   :  { %2957 = vmatpush1.bf16.msra.mxu0 %v2956_v42  ;;  %2989 = vmatpush1.bf16.msra.mxu1 %v2988_v10  ;;  %v2231_v42 = vld [vmem:[#allocation6 + $0x1d0] sm:$0xff] }
 0x669   :  { %2959 = vmatprep.subr.bf16.mxu0 %v2958_v58  ;;  %2991 = vmatprep.subr.bf16.mxu1 %v2990_v12  ;;  %v3008_v10 = vpack.c.bf16 %v2235_v57, %v2231_v42 }
 0x66c   :  { %2961 = vmatpush1.bf16.msra.mxu0 %v2960_v37  ;;  %2993 = vmatpush1.bf16.msra.mxu1 %v2992_v54  ;;  %v4230_v54 = vld [vmem:[#allocation12_spill] sm:$0xff] }
 0x66d   :  { %2963 = vmatprep.subr.bf16.mxu0 %v2962_v45  ;;  %2995 = vmatprep.subr.bf16.mxu1 %v2994_v25  ;;  %v4231_v60 = vsel %vm3525_vm2, %v4229_v35, %v4230_v54  ;;  %v4233_v45 = vld [vmem:[#allocation14_spill] sm:$0xff] }
 0x66e   :  { %v4234_v16 = vsel %vm3542_vm4, %v4232_v40, %v4233_v45 }
 0x670   :  { %2965 = vmatpush1.bf16.msra.mxu0 %v2964_v50  ;;  %2997 = vmatpush1.bf16.msra.mxu1 %v2996_v61 }
 0x671   :  { %2967 = vmatprep.subr.bf16.mxu0 %v2966_v41  ;;  %2999 = vmatprep.subr.bf16.mxu1 %v2998_v52 }
 0x674   :  { %2969 = vmatpush1.bf16.msra.mxu0 %v2968_v48  ;;  %3001 = vmatpush1.bf16.msra.mxu1 %v3000_v5 }
 0x675   :  { %2971 = vmatprep.subr.bf16.mxu0 %v2970_v4  ;;  %3003 = vmatprep.subr.bf16.mxu1 %v3002_v14  ;;  %v4236_v4 = vld [vmem:[#allocation35_spill] sm:$0xff] }
 0x678   :  { %2973 = vmatpush1.bf16.msra.mxu0 %v2972_v34  ;;  %3005 = vmatpush1.bf16.msra.mxu1 %v3004_v24  ;;  %v4239_v34 = vld [vmem:[#allocation36_spill] sm:$0xff]  ;;  %v4242_v24 = vld [vmem:[#allocation38_spill] sm:$0xff] }
 0x679   :  { %2975 = vmatprep.subr.bf16.mxu0 %v2974_v18  ;;  %3007 = vmatprep.subr.bf16.mxu1 %v3006_v29  ;;  %v4241_v49 = vsel %vm3525_vm2, %v4239_v34, %v4240_v23  ;;  %v4243_v18 = vld [vmem:[#allocation37_spill] sm:$0xff] }
 0x67a   :  { %v4244_v56 = vsel %vm3542_vm4, %v4242_v24, %v4243_v18 }
 0x67c   :  { %2977 = vmatpush1.bf16.msra.mxu0 %v2976_v7  ;;  %3009 = vmatpush1.bf16.msra.mxu1 %v3008_v10 }
 0x731   :  { %v2071_v20 = vpop.f32.mrb[28].mxu0  ;;  %v2142_v36 = vpop.f32.mrb[28].mxu1 }
 0x732   :  { %v2072_v58 = vadd.f32 %v2071_v20, %v4225_v53  ;;  %v2143_v12 = vadd.f32 %v2142_v36, %v4228_v2  ;;  %v2073_v37 = vpop.f32.mrb[29].mxu0  ;;  %v2144_v11 = vpop.f32.mrb[29].mxu1 }
 0x733   :  { %v2074_v17 = vadd.f32 %v2073_v37, %v4231_v60  ;;  %v2145_v33 = vadd.f32 %v2144_v11, %v4234_v16 }
 0x734   :  { %v2476_v46 = vmul.f32 -1.442695, %v2072_v58  ;;  %v2478_v50 = vmul.f32 -1.442695, %v2143_v12 }
 0x735   :  { %v2477_v25 = vmul.f32 -1.442695, %v2074_v17 }
 0x736   :  { %3114 = vpow2.f32 %v2476_v46 }
 0x737   :  { %3116 = vpow2.f32 %v2477_v25 }
 0x738   :  { %3118 = vtanh.f32 %v2145_v33 }
 0x739   :  { %3120 = vpow2.f32 %v2478_v50 }
 0x740   :  { %v3115_v27 = vpop.eup %3114 }
 0x741   :  { %v2156_v47 = vadd.f32 1.0, %v3115_v27  ;;  %v3117_v61 = vpop.eup %3116 }
 0x742   :  { %v2157_v30 = vadd.f32 1.0, %v3117_v61  ;;  %v3119_v44 = vpop.eup %3118 }
 0x743   :  { %3122 = vrcp.f32 %v2156_v47  ;;  %v3121_v9 = vpop.eup %3120 }
 0x744   :  { %3124 = vrcp.f32 %v2157_v30  ;;  %v2158_v51 = vadd.f32 1.0, %v3121_v9 }
 0x746   :  { %3126 = vrcp.f32 %v2158_v51 }
 0x74d   :  { %v3123_v41 = vpop.eup %3122 }
 0x74e   :  { %v2167_v28 = vmul.f32 %v3123_v41, %v3119_v44  ;;  %v3125_v43 = vpop.eup %3124 }
 0x74f   :  { %v2166_v52 = vmul.f32 %v3125_v43, %v4060_v1  ;;  %v4237_v1 = vld [vmem:[#allocation34_spill] sm:$0xff] }
 0x750   :  { %v3127_v59 = vpop.eup %3126  ;;  %v4238_v14 = vsel %vm3535_vm3, %v4236_v4, %v4237_v1 }
 0x751   :  { %v2168_v48 = vadd.f32 %v2167_v28, %v2166_v52 }
 0x753   :  { %3128 = vtanh.f32 %v2168_v48 }
 0x75d   :  { %v3129_v39 = vpop.eup %3128 }
 0x75e   :  { %v2170_v62 = vmul.f32 %v3129_v39, %v3127_v59 }
 0x760   :  { %2171 = vst.msk [vmem:[#allocation8 + $0x30] sm:$0xff] %vm680_vm5, %v2170_v62  ;;  %2314 = vmatmul.mubr.f32.vlgmr.msra.gmra.mrb[30].mxu0 %v2170_v62  ;;  %2385 = vmatmul.mubr.f32.vlgmr.msra.gmra.mrb[30].mxu1 %v2170_v62 }
 0x761   :  { %2172 = vst.msk [vmem:[#allocation8 + $0x8] sm:$0xff] %vm683_vm6, %v2170_v62 }
 0x833   :  { %v2315_v5 = vpop.f32.mrb[30].mxu0  ;;  %v2386_v38 = vpop.f32.mrb[30].mxu1 }
 0x834   :  { %v2316_v8 = vadd.f32 %v2315_v5, %v4235_v32  ;;  %v2387_v22 = vadd.f32 %v2386_v38, %v4238_v14  ;;  %v2317_v26 = vpop.f32.mrb[31].mxu0  ;;  %v2388_v63 = vpop.f32.mrb[31].mxu1 }
 0x835   :  { %v2318_v55 = vadd.f32 %v2317_v26, %v4241_v49  ;;  %v2389_v31 = vadd.f32 %v2388_v63, %v4244_v56 }
 0x836   :  { %v2479_v0 = vmul.f32 -1.442695, %v2316_v8  ;;  %v2481_v29 = vmul.f32 -1.442695, %v2387_v22 }
 0x837   :  { %v2480_v21 = vmul.f32 -1.442695, %v2318_v55 }
 0x838   :  { %3130 = vpow2.f32 %v2479_v0 }
 0x839   :  { %3132 = vpow2.f32 %v2480_v21 }
 0x83a   :  { %3134 = vtanh.f32 %v2389_v31 }
 0x83b   :  { %3136 = vpow2.f32 %v2481_v29 }
 0x842   :  { %v3131_v19 = vpop.eup %3130 }
 0x843   :  { %v2400_v42 = vadd.f32 1.0, %v3131_v19  ;;  %v3133_v57 = vpop.eup %3132 }
 0x844   :  { %v2401_v6 = vadd.f32 1.0, %v3133_v57  ;;  %v3135_v7 = vpop.eup %3134 }
 0x845   :  { %3138 = vrcp.f32 %v2400_v42  ;;  %v3137_v10 = vpop.eup %3136 }
 0x846   :  { %3140 = vrcp.f32 %v2401_v6  ;;  %v2402_v53 = vadd.f32 1.0, %v3137_v10 }
 0x848   :  { %3142 = vrcp.f32 %v2402_v53 }
 0x84f   :  { %v3139_v3 = vpop.eup %3138 }
 0x850   :  { %v2411_v20 = vmul.f32 %v3139_v3, %v3135_v7  ;;  %v3141_v36 = vpop.eup %3140 }
 0x851   :  { %v2410_v58 = vmul.f32 %v3141_v36, %v2168_v48 }
 0x852   :  { %v3143_v15 = vpop.eup %3142 }
 0x853   :  { %v2412_v13 = vadd.f32 %v2411_v20, %v2410_v58 }
 0x855   :  { %3144 = vtanh.f32 %v2412_v13 }
 0x85f   :  { %v3145_v2 = vpop.eup %3144 }
 0x860   :  { %v2414_v12 = vmul.f32 %v3145_v2, %v3143_v15 }
 0x862   :  { %2415 = vst.msk [vmem:[#allocation8 + $0x38] sm:$0xff] %vm680_vm5, %v2414_v12 }
 0x863   :  { %2416 = vst.msk [vmem:[#allocation8] sm:$0xff] %vm683_vm6, %v2414_v12 }
 0x864   :  { %3201 = shalt.err (!%p3198_p6)
}
 0x865   :  { %s3202_s8 = scalar_lea.hbm %s4120_s4, 1024 }
 0x866   :  { %p3203_p7 = scmp.ne.s32.totalorder %s4120_s4, %s3202_s8  ;;  %p3206_p8 = scmp.lt.u32.totalorder %s3202_s8, %s4120_s4 }
 0x868   :  { %p3208_p9 = pnand %p3206_p8, %p3203_p7 }
 0x86a   :  { %3211 = shalt.err (!%p3208_p9)
}
 0x86b   :  { %s3224_s1 = smov 128   ;;  %s3225_s13 = smov 8  }
 0x86c   :  { %2428 = dma.vmem_to_hbm [thread:$0]  %s2423_s30, 1024, %s4120_s4, [#allocation5], %s3224_s1, %s3224_s1, %s3225_s13  }
 0x86d   :  { %3216 = dma.done.wait [#allocation5], 1024  }
 0x86e   :  { %3217 = vsyncadd [#allocation5], 4294966272 }
 0x86f   :  { %2432 = vsyncpa [#allocation4], 1 }
 0x870   :  { %2433 = vsyncpa [#allocation7], 1 }
 0x871   :  { %2434 = vsyncpa [#allocation5], 1 }

</bundles_post_ra>
